<compile_context>
chip_gen: v5e
topology: v5e:2x2
jax: 0.10.0
libtpu: 0.0.40
codegen_flags: <defaults>
</compile_context>

<pallas_src>
import functools

import jax
import jax.numpy as jnp
from jax.experimental import pallas as pl
from jax.experimental.pallas import tpu as pltpu


def attn_block_kernel(
    xq_ref, xf_ref, kv_ref,
    wkv_ref, bkv_ref,
    wq_ref, bq_ref, wk_ref, bk_ref, wv_ref, bv_ref,
    wo_ref, bo_ref,
    o_ref,
    kv_buf,
    *, nhead: int, eps: float,
):
    f32 = jnp.float32
    bf16 = jnp.bfloat16

    xq = xq_ref[0]                      # (TQ, C) f32 — raw tokens for this query tile
    xf = xf_ref[0]                      # (HW, C) f32 — full image tokens (key/value source)
    kv_in = kv_ref[0]                   # (S, c_cond) f32

    HW = xf.shape[0]
    S = kv_in.shape[0]
    C = xq.shape[-1]
    dh = C // nhead

    def layer_norm(t):                  # WuerstchenLayerNorm: channel LN, no affine
        mu = jnp.mean(t, axis=-1, keepdims=True)
        tc = t - mu
        var = jnp.mean(tc * tc, axis=-1, keepdims=True)
        return tc * jax.lax.rsqrt(var + eps)

    # kv_mapper: SiLU -> Linear(c_cond, C)
    kv_act = (kv_in * jax.nn.sigmoid(kv_in)).astype(bf16)
    kv_map = jnp.dot(kv_act, wkv_ref[...], preferred_element_type=f32) + bkv_ref[...]

    # self_attn=True: [norm_x ; kv_map] staged in one bf16 VMEM scratch
    # (no jnp.concatenate copy of an (HW+S, C) f32 tensor).
    kv_buf[pl.ds(0, HW), :] = layer_norm(xf).astype(bf16)
    kv_buf[pl.ds(HW, S), :] = kv_map.astype(bf16)
    kv_cat = kv_buf[...]                # (HW + S, C) bf16

    # LayerNorm is per-token, so the q tile can be normalized independently.
    norm_q = layer_norm(xq).astype(bf16)

    # q/k/v projections: single big K=C matmuls, bf16 in / f32 accumulation.
    # 1/sqrt(dh) is already folded into wq/bq by the wrapper.
    q = (jnp.dot(norm_q, wq_ref[...], preferred_element_type=f32) + bq_ref[...]).astype(bf16)
    k = (jnp.dot(kv_cat, wk_ref[...], preferred_element_type=f32) + bk_ref[...]).astype(bf16)
    v = (jnp.dot(kv_cat, wv_ref[...], preferred_element_type=f32) + bv_ref[...]).astype(bf16)

    # Multi-head attention; output projection accumulated per head (no lane concat).
    acc = jnp.zeros((xq.shape[0], C), f32)
    for h in range(nhead):
        qh = q[:, h * dh:(h + 1) * dh]            # (TQ, dh)
        kh = k[:, h * dh:(h + 1) * dh]            # (HW+S, dh)
        vh = v[:, h * dh:(h + 1) * dh]            # (HW+S, dh)
        # QK^T without materializing kh.T: contract the last dim of both sides.
        s = jax.lax.dot_general(qh, kh, (((1,), (1,)), ((), ())),
                                preferred_element_type=f32)      # (TQ, HW+S)
        m = jnp.max(s, axis=-1, keepdims=True)
        p = jnp.exp(s - m)
        denom = jnp.sum(p, axis=-1, keepdims=True)
        oh = jnp.dot(p.astype(bf16), vh, preferred_element_type=f32)   # (TQ, dh)
        oh = oh * pl.reciprocal(denom, approx=True)   # deferred softmax normalization
        acc = acc + jnp.dot(oh.astype(bf16), wo_ref[h], preferred_element_type=f32)

    # to_out[0] bias; to_out[1] is Dropout(p=0.0) -> identity. Residual on raw x.
    o_ref[0] = xq + acc + bo_ref[...]


def attn_block(x_nchw, kv, params, *, nhead: int, eps: float = 1e-6, tq=None):
    B, C, H, W = x_nchw.shape
    _, S, Ccond = kv.shape
    HW = H * W
    assert C % nhead == 0
    dh = C // nhead
    if tq is None:
        tq = HW if HW <= 256 else 256
    assert HW % tq == 0
    assert tq == HW or tq % 8 == 0
    num_q = HW // tq

    # TODO(synk): keep the surrounding model in NHWC end-to-end to drop these two
    # extra HBM passes (NCHW <-> NHWC transposes around the kernel).
    x_tok = jnp.transpose(x_nchw, (0, 2, 3, 1)).reshape(B, HW, C)

    wkv, bkv, wq, bq, wk, bk, wv, bv, wo, bo = params
    f32, bf16 = jnp.float32, jnp.bfloat16
    scale = 1.0 / float(dh) ** 0.5

    # bf16 weights (f32 accumulation in-kernel); fold attention scale into q proj.
    wkv_b = wkv.astype(bf16)
    wq_b = (wq * scale).astype(bf16)
    bq_f = (bq * scale).astype(f32)
    wk_b = wk.astype(bf16)
    wv_b = wv.astype(bf16)
    wo_b = wo.reshape(nhead, dh, C).astype(bf16)   # head-major rows of to_out[0]
    bkv_f = bkv.astype(f32)
    bk_f = bk.astype(f32)
    bv_f = bv.astype(f32)
    bo_f = bo.astype(f32)

    kernel = functools.partial(attn_block_kernel, nhead=nhead, eps=eps)

    def const_spec(shape):
        # Constant block index across the grid -> fetched once, reused every step.
        # TODO(synk): single-buffer these via pipeline_mode=pl.Buffered(1) once
        # confirmed on the target jax build (halves weight VMEM at large C).
        return pl.BlockSpec(shape, lambda b, t: (0,) * len(shape))

    w_bytes = (2 * (wkv_b.size + wq_b.size + wk_b.size + wv_b.size + wo_b.size)
               + 4 * (bkv_f.size + bq_f.size + bk_f.size + bv_f.size + bo_f.size))
    flops = int(
        2 * B * num_q * ((HW + S) * C * C * 2 + S * Ccond * C)   # k/v proj + kv_mapper per q-tile
        + 2 * B * HW * C * C * 2                                 # q proj + out proj
        + 2 * B * HW * (HW + S) * C * 2                          # QK^T + PV over all heads
    )
    cost = pl.CostEstimate(
        flops=flops,
        transcendentals=int(B * num_q * (HW * (HW + S) + S * Ccond)),
        bytes_accessed=int(4 * (3 * B * HW * C + B * S * Ccond) + w_bytes),
    )

    out_tok = pl.pallas_call(
        kernel,
        out_shape=jax.ShapeDtypeStruct((B, HW, C), f32),
        grid=(B, num_q),
        in_specs=[
            pl.BlockSpec((1, tq, C), lambda b, t: (b, t, 0)),      # query tile (raw x)
            pl.BlockSpec((1, HW, C), lambda b, t: (b, 0, 0)),      # full tokens for k/v
            pl.BlockSpec((1, S, Ccond), lambda b, t: (b, 0, 0)),   # conditioning kv
            const_spec((Ccond, C)), const_spec((1, C)),            # kv_mapper Linear
            const_spec((C, C)), const_spec((1, C)),                # to_q (scale folded)
            const_spec((C, C)), const_spec((1, C)),                # to_k
            const_spec((C, C)), const_spec((1, C)),                # to_v
            const_spec((nhead, dh, C)), const_spec((1, C)),        # to_out[0] (head-major)
        ],
        out_specs=pl.BlockSpec((1, tq, C), lambda b, t: (b, t, 0)),
        scratch_shapes=[pltpu.VMEM((HW + S, C), bf16)],
        compiler_params=pltpu.CompilerParams(
            dimension_semantics=("parallel", "parallel"),
            vmem_limit_bytes=48 * 1024 * 1024),
        cost_estimate=cost,
    )(x_tok, x_tok, kv, wkv_b, bkv_f, wq_b, bq_f, wk_b, bk_f, wv_b, bv_f, wo_b, bo_f)

    return jnp.transpose(out_tok.reshape(B, H, W, C), (0, 3, 1, 2))


def _reference(x_nchw, kv, params, *, nhead: int, eps: float = 1e-6):
    """Pure-JAX f32 reference mirroring the PyTorch forward."""
    wkv, bkv, wq, bq, wk, bk, wv, bv, wo, bo = params
    B, C, H, W = x_nchw.shape
    dh = C // nhead
    x_tok = jnp.transpose(x_nchw, (0, 2, 3, 1)).reshape(B, H * W, C)

    mean = jnp.mean(x_tok, axis=-1, keepdims=True)
    var = jnp.mean((x_tok - mean) ** 2, axis=-1, keepdims=True)
    norm_x = (x_tok - mean) / jnp.sqrt(var + eps)

    kv_map = jax.nn.silu(kv) @ wkv + bkv[0]
    kv_cat = jnp.concatenate([norm_x, kv_map], axis=1)

    q = norm_x @ wq + bq[0]
    k = kv_cat @ wk + bk[0]
    v = kv_cat @ wv + bv[0]

    def split(t):
        return t.reshape(B, t.shape[1], nhead, dh).transpose(0, 2, 1, 3)

    qh, kh, vh = split(q), split(k), split(v)
    s = jnp.einsum("bhqd,bhkd->bhqk", qh, kh) / jnp.sqrt(dh)
    p = jax.nn.softmax(s, axis=-1)
    o = jnp.einsum("bhqk,bhkd->bhqd", p, vh)
    o = o.transpose(0, 2, 1, 3).reshape(B, H * W, C)
    o = o @ wo + bo[0]
    y = x_tok + o
    return jnp.transpose(y.reshape(B, H, W, C), (0, 3, 1, 2))


if __name__ == "__main__":
    # Small shapes consistent with the module.
    B, C, H, W = 2, 32, 8, 8
    c_cond, S = 16, 8
    nhead = 4

    key = jax.random.PRNGKey(0)
    keys = jax.random.split(key, 12)

    x = jax.random.normal(keys[0], (B, C, H, W), jnp.float32)
    kv = jax.random.normal(keys[1], (B, S, c_cond), jnp.float32)

    def w(k, shape, scale=0.05):
        return (scale * jax.random.normal(k, shape)).astype(jnp.float32)

    # Weights in (in, out) layout; biases as (1, out). Deterministic synthetic init.
    params = (
        w(keys[2], (c_cond, C)), w(keys[3], (1, C)),   # kv_mapper Linear
        w(keys[4], (C, C)),      w(keys[5], (1, C)),   # to_q
        w(keys[6], (C, C)),      w(keys[7], (1, C)),   # to_k
        w(keys[8], (C, C)),      w(keys[9], (1, C)),   # to_v
        w(keys[10], (C, C)),     w(keys[11], (1, C)),  # to_out[0]
    )

    y = attn_block(x, kv, params, nhead=nhead, tq=32)
    y = jax.block_until_ready(y)

    y_ref = _reference(x, kv, params, nhead=nhead)
    assert y.shape == (B, C, H, W)
    # bf16 matmuls + approx reciprocal vs an all-f32 reference -> loose tolerance.
    assert jnp.allclose(y, y_ref, atol=2e-2, rtol=2e-2), "mismatch vs reference"

    print("KERNEL_OK")
</pallas_src>

<mosaic_0001>
module attributes {stable_mosaic.version = 11 : i64} {
  func.func @attn_block_kernel(%arg0: i32, %arg1: i32, %arg2: memref<1x32x32xf32, #tpu.memory_space<vmem>>, %arg3: memref<1x64x32xf32, #tpu.memory_space<vmem>>, %arg4: memref<1x8x16xf32, #tpu.memory_space<vmem>>, %arg5: memref<16x32xbf16, #tpu.memory_space<vmem>>, %arg6: memref<1x32xf32, #tpu.memory_space<vmem>>, %arg7: memref<32x32xbf16, #tpu.memory_space<vmem>>, %arg8: memref<1x32xf32, #tpu.memory_space<vmem>>, %arg9: memref<32x32xbf16, #tpu.memory_space<vmem>>, %arg10: memref<1x32xf32, #tpu.memory_space<vmem>>, %arg11: memref<32x32xbf16, #tpu.memory_space<vmem>>, %arg12: memref<1x32xf32, #tpu.memory_space<vmem>>, %arg13: memref<4x8x32xbf16, #tpu.memory_space<vmem>>, %arg14: memref<1x32xf32, #tpu.memory_space<vmem>>, %arg15: memref<1x32x32xf32, #tpu.memory_space<vmem>>, %arg16: memref<72x32xbf16, #tpu.memory_space<vmem>>) attributes {dimension_semantics = [#tpu.dimension_semantics<parallel>, #tpu.dimension_semantics<parallel>], iteration_bounds = array<i64: 2, 2>, scalar_prefetch = 0 : i64, scratch_operands = 1 : i64, tpu.core_type = #tpu.core_type<tc>, window_params = [{transform_indices = @transform_0, window_bounds = array<i64: 1, 32, 32>}, {transform_indices = @transform_1, window_bounds = array<i64: 1, 64, 32>}, {transform_indices = @transform_2, window_bounds = array<i64: 1, 8, 16>}, {pipeline_mode = #tpu.pipeline_mode<synchronous>, transform_indices = @transform_3, window_bounds = array<i64: 16, 32>}, {pipeline_mode = #tpu.pipeline_mode<synchronous>, transform_indices = @transform_4, window_bounds = array<i64: 1, 32>}, {pipeline_mode = #tpu.pipeline_mode<synchronous>, transform_indices = @transform_5, window_bounds = array<i64: 32, 32>}, {pipeline_mode = #tpu.pipeline_mode<synchronous>, transform_indices = @transform_6, window_bounds = array<i64: 1, 32>}, {pipeline_mode = #tpu.pipeline_mode<synchronous>, transform_indices = @transform_7, window_bounds = array<i64: 32, 32>}, {pipeline_mode = #tpu.pipeline_mode<synchronous>, transform_indices = @transform_8, window_bounds = array<i64: 1, 32>}, {pipeline_mode = #tpu.pipeline_mode<synchronous>, transform_indices = @transform_9, window_bounds = array<i64: 32, 32>}, {pipeline_mode = #tpu.pipeline_mode<synchronous>, transform_indices = @transform_10, window_bounds = array<i64: 1, 32>}, {pipeline_mode = #tpu.pipeline_mode<synchronous>, transform_indices = @transform_11, window_bounds = array<i64: 4, 8, 32>}, {pipeline_mode = #tpu.pipeline_mode<synchronous>, transform_indices = @transform_12, window_bounds = array<i64: 1, 32>}, {transform_indices = @transform_13, window_bounds = array<i64: 1, 32, 32>}]} {
    %c0 = arith.constant 0 : index
    %c0_0 = arith.constant 0 : index
    %c0_1 = arith.constant 0 : index
    %0 = vector.load %arg2[%c0, %c0_0, %c0_1] : memref<1x32x32xf32, #tpu.memory_space<vmem>>, vector<1x32x32xf32>
    %1 = vector.shape_cast %0 : vector<1x32x32xf32> to vector<32x32xf32>
    %c0_2 = arith.constant 0 : index
    %c0_3 = arith.constant 0 : index
    %c0_4 = arith.constant 0 : index
    %2 = vector.load %arg3[%c0_2, %c0_3, %c0_4] : memref<1x64x32xf32, #tpu.memory_space<vmem>>, vector<1x64x32xf32>
    %3 = vector.shape_cast %2 : vector<1x64x32xf32> to vector<64x32xf32>
    %c0_5 = arith.constant 0 : index
    %c0_6 = arith.constant 0 : index
    %c0_7 = arith.constant 0 : index
    %4 = vector.load %arg4[%c0_5, %c0_6, %c0_7] : memref<1x8x16xf32, #tpu.memory_space<vmem>>, vector<1x8x16xf32>
    %5 = vector.shape_cast %4 : vector<1x8x16xf32> to vector<8x16xf32>
    %6 = arith.negf %5 : vector<8x16xf32>
    %7 = math.exp %6 : vector<8x16xf32>
    %cst = arith.constant 1.000000e+00 : f32
    %8 = vector.broadcast %cst : f32 to vector<8x16xf32>
    %9 = arith.addf %8, %7 : vector<8x16xf32>
    %10 = arith.divf %8, %9 : vector<8x16xf32>
    %11 = arith.mulf %5, %10 : vector<8x16xf32>
    %12 = arith.truncf %11 : vector<8x16xf32> to vector<8x16xbf16>
    %c0_8 = arith.constant 0 : index
    %c0_9 = arith.constant 0 : index
    %13 = vector.load %arg5[%c0_8, %c0_9] : memref<16x32xbf16, #tpu.memory_space<vmem>>, vector<16x32xbf16>
    %cst_10 = arith.constant dense<0.000000e+00> : vector<8x32xf32>
    %14 = tpu.matmul %12, %13, %cst_10 {dimension_numbers = #tpu.dot_dimension_numbers<[1], [0], [0], [1], [0, 0, 1, 1], [], []>} : vector<8x16xbf16>, vector<16x32xbf16>, vector<8x32xf32> -> vector<8x32xf32>
    %c0_11 = arith.constant 0 : index
    %c0_12 = arith.constant 0 : index
    %15 = vector.load %arg6[%c0_11, %c0_12] : memref<1x32xf32, #tpu.memory_space<vmem>>, vector<1x32xf32>
    %16 = vector.broadcast %15 : vector<1x32xf32> to vector<8x32xf32>
    %17 = arith.addf %14, %16 : vector<8x32xf32>
    %cst_13 = arith.constant dense<0.000000e+00> : vector<64xf32>
    %18 = vector.multi_reduction <add>, %3, %cst_13 [1] : vector<64x32xf32> to vector<64xf32>
    %19 = vector.shape_cast %18 : vector<64xf32> to vector<64x1xf32>
    %cst_14 = arith.constant 3.200000e+01 : f32
    %20 = vector.broadcast %cst_14 : f32 to vector<64x1xf32>
    %21 = arith.divf %19, %20 : vector<64x1xf32>
    %22 = vector.broadcast %21 : vector<64x1xf32> to vector<64x32xf32>
    %23 = arith.subf %3, %22 : vector<64x32xf32>
    %24 = arith.mulf %23, %23 : vector<64x32xf32>
    %cst_15 = arith.constant dense<0.000000e+00> : vector<64xf32>
    %25 = vector.multi_reduction <add>, %24, %cst_15 [1] : vector<64x32xf32> to vector<64xf32>
    %26 = vector.shape_cast %25 : vector<64xf32> to vector<64x1xf32>
    %cst_16 = arith.constant 3.200000e+01 : f32
    %27 = vector.broadcast %cst_16 : f32 to vector<64x1xf32>
    %28 = arith.divf %26, %27 : vector<64x1xf32>
    %cst_17 = arith.constant 9.99999997E-7 : f32
    %29 = vector.broadcast %cst_17 : f32 to vector<64x1xf32>
    %30 = arith.addf %28, %29 : vector<64x1xf32>
    %31 = math.rsqrt %30 : vector<64x1xf32>
    %32 = vector.broadcast %31 : vector<64x1xf32> to vector<64x32xf32>
    %33 = arith.mulf %23, %32 : vector<64x32xf32>
    %34 = arith.truncf %33 : vector<64x32xf32> to vector<64x32xbf16>
    %c0_18 = arith.constant 0 : index
    %c0_19 = arith.constant 0 : index
    %35 = vector.load %arg16[%c0_18, %c0_19] : memref<72x32xbf16, #tpu.memory_space<vmem>>, vector<64x32xbf16>
    tpu.vector_store %arg16[%c0_18, %c0_19], %34 {strides = array<i32>} : memref<72x32xbf16, #tpu.memory_space<vmem>>, vector<64x32xbf16>,
    %36 = arith.truncf %17 : vector<8x32xf32> to vector<8x32xbf16>
    %c64 = arith.constant 64 : index
    %c0_20 = arith.constant 0 : index
    %37 = vector.load %arg16[%c64, %c0_20] : memref<72x32xbf16, #tpu.memory_space<vmem>>, vector<8x32xbf16>
    tpu.vector_store %arg16[%c64, %c0_20], %36 {strides = array<i32>} : memref<72x32xbf16, #tpu.memory_space<vmem>>, vector<8x32xbf16>,
    %c0_21 = arith.constant 0 : index
    %c0_22 = arith.constant 0 : index
    %38 = vector.load %arg16[%c0_21, %c0_22] : memref<72x32xbf16, #tpu.memory_space<vmem>>, vector<72x32xbf16>
    %cst_23 = arith.constant dense<0.000000e+00> : vector<32xf32>
    %39 = vector.multi_reduction <add>, %1, %cst_23 [1] : vector<32x32xf32> to vector<32xf32>
    %40 = vector.shape_cast %39 : vector<32xf32> to vector<32x1xf32>
    %cst_24 = arith.constant 3.200000e+01 : f32
    %41 = vector.broadcast %cst_24 : f32 to vector<32x1xf32>
    %42 = arith.divf %40, %41 : vector<32x1xf32>
    %43 = vector.broadcast %42 : vector<32x1xf32> to vector<32x32xf32>
    %44 = arith.subf %1, %43 : vector<32x32xf32>
    %45 = arith.mulf %44, %44 : vector<32x32xf32>
    %cst_25 = arith.constant dense<0.000000e+00> : vector<32xf32>
    %46 = vector.multi_reduction <add>, %45, %cst_25 [1] : vector<32x32xf32> to vector<32xf32>
    %47 = vector.shape_cast %46 : vector<32xf32> to vector<32x1xf32>
    %cst_26 = arith.constant 3.200000e+01 : f32
    %48 = vector.broadcast %cst_26 : f32 to vector<32x1xf32>
    %49 = arith.divf %47, %48 : vector<32x1xf32>
    %cst_27 = arith.constant 9.99999997E-7 : f32
    %50 = vector.broadcast %cst_27 : f32 to vector<32x1xf32>
    %51 = arith.addf %49, %50 : vector<32x1xf32>
    %52 = math.rsqrt %51 : vector<32x1xf32>
    %53 = vector.broadcast %52 : vector<32x1xf32> to vector<32x32xf32>
    %54 = arith.mulf %44, %53 : vector<32x32xf32>
    %55 = arith.truncf %54 : vector<32x32xf32> to vector<32x32xbf16>
    %c0_28 = arith.constant 0 : index
    %c0_29 = arith.constant 0 : index
    %56 = vector.load %arg7[%c0_28, %c0_29] : memref<32x32xbf16, #tpu.memory_space<vmem>>, vector<32x32xbf16>
    %cst_30 = arith.constant dense<0.000000e+00> : vector<32x32xf32>
    %57 = tpu.matmul %55, %56, %cst_30 {dimension_numbers = #tpu.dot_dimension_numbers<[1], [0], [0], [1], [0, 0, 1, 1], [], []>} : vector<32x32xbf16>, vector<32x32xbf16>, vector<32x32xf32> -> vector<32x32xf32>
    %c0_31 = arith.constant 0 : index
    %c0_32 = arith.constant 0 : index
    %58 = vector.load %arg8[%c0_31, %c0_32] : memref<1x32xf32, #tpu.memory_space<vmem>>, vector<1x32xf32>
    %59 = vector.broadcast %58 : vector<1x32xf32> to vector<32x32xf32>
    %60 = arith.addf %57, %59 : vector<32x32xf32>
    %61 = arith.truncf %60 : vector<32x32xf32> to vector<32x32xbf16>
    %c0_33 = arith.constant 0 : index
    %c0_34 = arith.constant 0 : index
    %62 = vector.load %arg9[%c0_33, %c0_34] : memref<32x32xbf16, #tpu.memory_space<vmem>>, vector<32x32xbf16>
    %cst_35 = arith.constant dense<0.000000e+00> : vector<72x32xf32>
    %63 = tpu.matmul %38, %62, %cst_35 {dimension_numbers = #tpu.dot_dimension_numbers<[1], [0], [0], [1], [0, 0, 1, 1], [], []>} : vector<72x32xbf16>, vector<32x32xbf16>, vector<72x32xf32> -> vector<72x32xf32>
    %c0_36 = arith.constant 0 : index
    %c0_37 = arith.constant 0 : index
    %64 = vector.load %arg10[%c0_36, %c0_37] : memref<1x32xf32, #tpu.memory_space<vmem>>, vector<1x32xf32>
    %65 = vector.broadcast %64 : vector<1x32xf32> to vector<72x32xf32>
    %66 = arith.addf %63, %65 : vector<72x32xf32>
    %67 = arith.truncf %66 : vector<72x32xf32> to vector<72x32xbf16>
    %c0_38 = arith.constant 0 : index
    %c0_39 = arith.constant 0 : index
    %68 = vector.load %arg11[%c0_38, %c0_39] : memref<32x32xbf16, #tpu.memory_space<vmem>>, vector<32x32xbf16>
    %cst_40 = arith.constant dense<0.000000e+00> : vector<72x32xf32>
    %69 = tpu.matmul %38, %68, %cst_40 {dimension_numbers = #tpu.dot_dimension_numbers<[1], [0], [0], [1], [0, 0, 1, 1], [], []>} : vector<72x32xbf16>, vector<32x32xbf16>, vector<72x32xf32> -> vector<72x32xf32>
    %c0_41 = arith.constant 0 : index
    %c0_42 = arith.constant 0 : index
    %70 = vector.load %arg12[%c0_41, %c0_42] : memref<1x32xf32, #tpu.memory_space<vmem>>, vector<1x32xf32>
    %71 = vector.broadcast %70 : vector<1x32xf32> to vector<72x32xf32>
    %72 = arith.addf %69, %71 : vector<72x32xf32>
    %73 = arith.truncf %72 : vector<72x32xf32> to vector<72x32xbf16>
    %cst_43 = arith.constant 0.000000e+00 : f32
    %74 = vector.broadcast %cst_43 : f32 to vector<32x32xf32>
    %75 = vector.extract_strided_slice %61 {offsets = [0, 0], sizes = [32, 8], strides = [1, 1]} : vector<32x32xbf16> to vector<32x8xbf16>
    %76 = vector.extract_strided_slice %67 {offsets = [0, 0], sizes = [72, 8], strides = [1, 1]} : vector<72x32xbf16> to vector<72x8xbf16>
    %77 = vector.extract_strided_slice %73 {offsets = [0, 0], sizes = [72, 8], strides = [1, 1]} : vector<72x32xbf16> to vector<72x8xbf16>
    %cst_44 = arith.constant dense<0.000000e+00> : vector<32x72xf32>
    %78 = tpu.matmul %75, %76, %cst_44 {dimension_numbers = #tpu.dot_dimension_numbers<[1], [1], [0], [0], [0, 0, 1, 0], [], []>} : vector<32x8xbf16>, vector<72x8xbf16>, vector<32x72xf32> -> vector<32x72xf32>
    %cst_45 = arith.constant dense<0xFF800000> : vector<32xf32>
    %79 = vector.multi_reduction <maximumf>, %78, %cst_45 [1] : vector<32x72xf32> to vector<32xf32>
    %80 = vector.shape_cast %79 : vector<32xf32> to vector<32x1xf32>
    %81 = vector.broadcast %80 : vector<32x1xf32> to vector<32x72xf32>
    %82 = arith.subf %78, %81 : vector<32x72xf32>
    %83 = math.exp %82 : vector<32x72xf32>
    %cst_46 = arith.constant dense<0.000000e+00> : vector<32xf32>
    %84 = vector.multi_reduction <add>, %83, %cst_46 [1] : vector<32x72xf32> to vector<32xf32>
    %85 = vector.shape_cast %84 : vector<32xf32> to vector<32x1xf32>
    %86 = arith.truncf %83 : vector<32x72xf32> to vector<32x72xbf16>
    %cst_47 = arith.constant dense<0.000000e+00> : vector<32x8xf32>
    %87 = tpu.matmul %86, %77, %cst_47 {dimension_numbers = #tpu.dot_dimension_numbers<[1], [0], [0], [1], [0, 0, 1, 1], [], []>} : vector<32x72xbf16>, vector<72x8xbf16>, vector<32x8xf32> -> vector<32x8xf32>
    %88 = tpu.reciprocal %85 {approx = true} : vector<32x1xf32> -> vector<32x1xf32>
    %89 = vector.broadcast %88 : vector<32x1xf32> to vector<32x8xf32>
    %90 = arith.mulf %87, %89 : vector<32x8xf32>
    %91 = arith.truncf %90 : vector<32x8xf32> to vector<32x8xbf16>
    %c0_48 = arith.constant 0 : index
    %c0_49 = arith.constant 0 : index
    %c0_50 = arith.constant 0 : index
    %92 = vector.load %arg13[%c0_48, %c0_49, %c0_50] : memref<4x8x32xbf16, #tpu.memory_space<vmem>>, vector<1x8x32xbf16>
    %93 = vector.shape_cast %92 : vector<1x8x32xbf16> to vector<8x32xbf16>
    %cst_51 = arith.constant dense<0.000000e+00> : vector<32x32xf32>
    %94 = tpu.matmul %91, %93, %cst_51 {dimension_numbers = #tpu.dot_dimension_numbers<[1], [0], [0], [1], [0, 0, 1, 1], [], []>} : vector<32x8xbf16>, vector<8x32xbf16>, vector<32x32xf32> -> vector<32x32xf32>
    %95 = arith.addf %74, %94 : vector<32x32xf32>
    %96 = vector.extract_strided_slice %61 {offsets = [0, 8], sizes = [32, 8], strides = [1, 1]} : vector<32x32xbf16> to vector<32x8xbf16>
    %97 = vector.extract_strided_slice %67 {offsets = [0, 8], sizes = [72, 8], strides = [1, 1]} : vector<72x32xbf16> to vector<72x8xbf16>
    %98 = vector.extract_strided_slice %73 {offsets = [0, 8], sizes = [72, 8], strides = [1, 1]} : vector<72x32xbf16> to vector<72x8xbf16>
    %cst_52 = arith.constant dense<0.000000e+00> : vector<32x72xf32>
    %99 = tpu.matmul %96, %97, %cst_52 {dimension_numbers = #tpu.dot_dimension_numbers<[1], [1], [0], [0], [0, 0, 1, 0], [], []>} : vector<32x8xbf16>, vector<72x8xbf16>, vector<32x72xf32> -> vector<32x72xf32>
    %cst_53 = arith.constant dense<0xFF800000> : vector<32xf32>
    %100 = vector.multi_reduction <maximumf>, %99, %cst_53 [1] : vector<32x72xf32> to vector<32xf32>
    %101 = vector.shape_cast %100 : vector<32xf32> to vector<32x1xf32>
    %102 = vector.broadcast %101 : vector<32x1xf32> to vector<32x72xf32>
    %103 = arith.subf %99, %102 : vector<32x72xf32>
    %104 = math.exp %103 : vector<32x72xf32>
    %cst_54 = arith.constant dense<0.000000e+00> : vector<32xf32>
    %105 = vector.multi_reduction <add>, %104, %cst_54 [1] : vector<32x72xf32> to vector<32xf32>
    %106 = vector.shape_cast %105 : vector<32xf32> to vector<32x1xf32>
    %107 = arith.truncf %104 : vector<32x72xf32> to vector<32x72xbf16>
    %cst_55 = arith.constant dense<0.000000e+00> : vector<32x8xf32>
    %108 = tpu.matmul %107, %98, %cst_55 {dimension_numbers = #tpu.dot_dimension_numbers<[1], [0], [0], [1], [0, 0, 1, 1], [], []>} : vector<32x72xbf16>, vector<72x8xbf16>, vector<32x8xf32> -> vector<32x8xf32>
    %109 = tpu.reciprocal %106 {approx = true} : vector<32x1xf32> -> vector<32x1xf32>
    %110 = vector.broadcast %109 : vector<32x1xf32> to vector<32x8xf32>
    %111 = arith.mulf %108, %110 : vector<32x8xf32>
    %112 = arith.truncf %111 : vector<32x8xf32> to vector<32x8xbf16>
    %c1 = arith.constant 1 : index
    %c0_56 = arith.constant 0 : index
    %c0_57 = arith.constant 0 : index
    %113 = vector.load %arg13[%c1, %c0_56, %c0_57] : memref<4x8x32xbf16, #tpu.memory_space<vmem>>, vector<1x8x32xbf16>
    %114 = vector.shape_cast %113 : vector<1x8x32xbf16> to vector<8x32xbf16>
    %cst_58 = arith.constant dense<0.000000e+00> : vector<32x32xf32>
    %115 = tpu.matmul %112, %114, %cst_58 {dimension_numbers = #tpu.dot_dimension_numbers<[1], [0], [0], [1], [0, 0, 1, 1], [], []>} : vector<32x8xbf16>, vector<8x32xbf16>, vector<32x32xf32> -> vector<32x32xf32>
    %116 = arith.addf %95, %115 : vector<32x32xf32>
    %117 = vector.extract_strided_slice %61 {offsets = [0, 16], sizes = [32, 8], strides = [1, 1]} : vector<32x32xbf16> to vector<32x8xbf16>
    %118 = vector.extract_strided_slice %67 {offsets = [0, 16], sizes = [72, 8], strides = [1, 1]} : vector<72x32xbf16> to vector<72x8xbf16>
    %119 = vector.extract_strided_slice %73 {offsets = [0, 16], sizes = [72, 8], strides = [1, 1]} : vector<72x32xbf16> to vector<72x8xbf16>
    %cst_59 = arith.constant dense<0.000000e+00> : vector<32x72xf32>
    %120 = tpu.matmul %117, %118, %cst_59 {dimension_numbers = #tpu.dot_dimension_numbers<[1], [1], [0], [0], [0, 0, 1, 0], [], []>} : vector<32x8xbf16>, vector<72x8xbf16>, vector<32x72xf32> -> vector<32x72xf32>
    %cst_60 = arith.constant dense<0xFF800000> : vector<32xf32>
    %121 = vector.multi_reduction <maximumf>, %120, %cst_60 [1] : vector<32x72xf32> to vector<32xf32>
    %122 = vector.shape_cast %121 : vector<32xf32> to vector<32x1xf32>
    %123 = vector.broadcast %122 : vector<32x1xf32> to vector<32x72xf32>
    %124 = arith.subf %120, %123 : vector<32x72xf32>
    %125 = math.exp %124 : vector<32x72xf32>
    %cst_61 = arith.constant dense<0.000000e+00> : vector<32xf32>
    %126 = vector.multi_reduction <add>, %125, %cst_61 [1] : vector<32x72xf32> to vector<32xf32>
    %127 = vector.shape_cast %126 : vector<32xf32> to vector<32x1xf32>
    %128 = arith.truncf %125 : vector<32x72xf32> to vector<32x72xbf16>
    %cst_62 = arith.constant dense<0.000000e+00> : vector<32x8xf32>
    %129 = tpu.matmul %128, %119, %cst_62 {dimension_numbers = #tpu.dot_dimension_numbers<[1], [0], [0], [1], [0, 0, 1, 1], [], []>} : vector<32x72xbf16>, vector<72x8xbf16>, vector<32x8xf32> -> vector<32x8xf32>
    %130 = tpu.reciprocal %127 {approx = true} : vector<32x1xf32> -> vector<32x1xf32>
    %131 = vector.broadcast %130 : vector<32x1xf32> to vector<32x8xf32>
    %132 = arith.mulf %129, %131 : vector<32x8xf32>
    %133 = arith.truncf %132 : vector<32x8xf32> to vector<32x8xbf16>
    %c2 = arith.constant 2 : index
    %c0_63 = arith.constant 0 : index
    %c0_64 = arith.constant 0 : index
    %134 = vector.load %arg13[%c2, %c0_63, %c0_64] : memref<4x8x32xbf16, #tpu.memory_space<vmem>>, vector<1x8x32xbf16>
    %135 = vector.shape_cast %134 : vector<1x8x32xbf16> to vector<8x32xbf16>
    %cst_65 = arith.constant dense<0.000000e+00> : vector<32x32xf32>
    %136 = tpu.matmul %133, %135, %cst_65 {dimension_numbers = #tpu.dot_dimension_numbers<[1], [0], [0], [1], [0, 0, 1, 1], [], []>} : vector<32x8xbf16>, vector<8x32xbf16>, vector<32x32xf32> -> vector<32x32xf32>
    %137 = arith.addf %116, %136 : vector<32x32xf32>
    %138 = vector.extract_strided_slice %61 {offsets = [0, 24], sizes = [32, 8], strides = [1, 1]} : vector<32x32xbf16> to vector<32x8xbf16>
    %139 = vector.extract_strided_slice %67 {offsets = [0, 24], sizes = [72, 8], strides = [1, 1]} : vector<72x32xbf16> to vector<72x8xbf16>
    %140 = vector.extract_strided_slice %73 {offsets = [0, 24], sizes = [72, 8], strides = [1, 1]} : vector<72x32xbf16> to vector<72x8xbf16>
    %cst_66 = arith.constant dense<0.000000e+00> : vector<32x72xf32>
    %141 = tpu.matmul %138, %139, %cst_66 {dimension_numbers = #tpu.dot_dimension_numbers<[1], [1], [0], [0], [0, 0, 1, 0], [], []>} : vector<32x8xbf16>, vector<72x8xbf16>, vector<32x72xf32> -> vector<32x72xf32>
    %cst_67 = arith.constant dense<0xFF800000> : vector<32xf32>
    %142 = vector.multi_reduction <maximumf>, %141, %cst_67 [1] : vector<32x72xf32> to vector<32xf32>
    %143 = vector.shape_cast %142 : vector<32xf32> to vector<32x1xf32>
    %144 = vector.broadcast %143 : vector<32x1xf32> to vector<32x72xf32>
    %145 = arith.subf %141, %144 : vector<32x72xf32>
    %146 = math.exp %145 : vector<32x72xf32>
    %cst_68 = arith.constant dense<0.000000e+00> : vector<32xf32>
    %147 = vector.multi_reduction <add>, %146, %cst_68 [1] : vector<32x72xf32> to vector<32xf32>
    %148 = vector.shape_cast %147 : vector<32xf32> to vector<32x1xf32>
    %149 = arith.truncf %146 : vector<32x72xf32> to vector<32x72xbf16>
    %cst_69 = arith.constant dense<0.000000e+00> : vector<32x8xf32>
    %150 = tpu.matmul %149, %140, %cst_69 {dimension_numbers = #tpu.dot_dimension_numbers<[1], [0], [0], [1], [0, 0, 1, 1], [], []>} : vector<32x72xbf16>, vector<72x8xbf16>, vector<32x8xf32> -> vector<32x8xf32>
    %151 = tpu.reciprocal %148 {approx = true} : vector<32x1xf32> -> vector<32x1xf32>
    %152 = vector.broadcast %151 : vector<32x1xf32> to vector<32x8xf32>
    %153 = arith.mulf %150, %152 : vector<32x8xf32>
    %154 = arith.truncf %153 : vector<32x8xf32> to vector<32x8xbf16>
    %c3 = arith.constant 3 : index
    %c0_70 = arith.constant 0 : index
    %c0_71 = arith.constant 0 : index
    %155 = vector.load %arg13[%c3, %c0_70, %c0_71] : memref<4x8x32xbf16, #tpu.memory_space<vmem>>, vector<1x8x32xbf16>
    %156 = vector.shape_cast %155 : vector<1x8x32xbf16> to vector<8x32xbf16>
    %cst_72 = arith.constant dense<0.000000e+00> : vector<32x32xf32>
    %157 = tpu.matmul %154, %156, %cst_72 {dimension_numbers = #tpu.dot_dimension_numbers<[1], [0], [0], [1], [0, 0, 1, 1], [], []>} : vector<32x8xbf16>, vector<8x32xbf16>, vector<32x32xf32> -> vector<32x32xf32>
    %158 = arith.addf %137, %157 : vector<32x32xf32>
    %159 = arith.addf %1, %158 : vector<32x32xf32>
    %c0_73 = arith.constant 0 : index
    %c0_74 = arith.constant 0 : index
    %160 = vector.load %arg14[%c0_73, %c0_74] : memref<1x32xf32, #tpu.memory_space<vmem>>, vector<1x32xf32>
    %161 = vector.broadcast %160 : vector<1x32xf32> to vector<32x32xf32>
    %162 = arith.addf %159, %161 : vector<32x32xf32>
    %c0_75 = arith.constant 0 : index
    %c0_76 = arith.constant 0 : index
    %c0_77 = arith.constant 0 : index
    %163 = vector.load %arg15[%c0_75, %c0_76, %c0_77] : memref<1x32x32xf32, #tpu.memory_space<vmem>>, vector<1x32x32xf32>
    %164 = vector.shape_cast %163 : vector<1x32x32xf32> to vector<32x32xf32>
    %165 = vector.shape_cast %162 : vector<32x32xf32> to vector<1x32x32xf32>
    tpu.vector_store %arg15[%c0_75, %c0_76, %c0_77], %165 {strides = array<i32>} : memref<1x32x32xf32, #tpu.memory_space<vmem>>, vector<1x32x32xf32>,
    return
  }
  func.func @transform_0(%arg0: i32, %arg1: i32) -> (i32, i32, i32) {
    %c0_i32 = arith.constant 0 : i32
    %c0_i32_0 = arith.constant 0 : i32
    return %arg0, %arg1, %c0_i32 : i32, i32, i32
  }
  func.func @transform_1(%arg0: i32, %arg1: i32) -> (i32, i32, i32) {
    %c0_i32 = arith.constant 0 : i32
    %c0_i32_0 = arith.constant 0 : i32
    %c0_i32_1 = arith.constant 0 : i32
    return %arg0, %c0_i32, %c0_i32_0 : i32, i32, i32
  }
  func.func @transform_2(%arg0: i32, %arg1: i32) -> (i32, i32, i32) {
    %c0_i32 = arith.constant 0 : i32
    %c0_i32_0 = arith.constant 0 : i32
    %c0_i32_1 = arith.constant 0 : i32
    return %arg0, %c0_i32, %c0_i32_0 : i32, i32, i32
  }
  func.func @transform_3(%arg0: i32, %arg1: i32) -> (i32, i32) {
    %c0_i32 = arith.constant 0 : i32
    %c0_i32_0 = arith.constant 0 : i32
    %c0_i32_1 = arith.constant 0 : i32
    return %c0_i32, %c0_i32_0 : i32, i32
  }
  func.func @transform_4(%arg0: i32, %arg1: i32) -> (i32, i32) {
    %c0_i32 = arith.constant 0 : i32
    %c0_i32_0 = arith.constant 0 : i32
    %c0_i32_1 = arith.constant 0 : i32
    return %c0_i32, %c0_i32_0 : i32, i32
  }
  func.func @transform_5(%arg0: i32, %arg1: i32) -> (i32, i32) {
    %c0_i32 = arith.constant 0 : i32
    %c0_i32_0 = arith.constant 0 : i32
    %c0_i32_1 = arith.constant 0 : i32
    return %c0_i32, %c0_i32_0 : i32, i32
  }
  func.func @transform_6(%arg0: i32, %arg1: i32) -> (i32, i32) {
    %c0_i32 = arith.constant 0 : i32
    %c0_i32_0 = arith.constant 0 : i32
    %c0_i32_1 = arith.constant 0 : i32
    return %c0_i32, %c0_i32_0 : i32, i32
  }
  func.func @transform_7(%arg0: i32, %arg1: i32) -> (i32, i32) {
    %c0_i32 = arith.constant 0 : i32
    %c0_i32_0 = arith.constant 0 : i32
    %c0_i32_1 = arith.constant 0 : i32
    return %c0_i32, %c0_i32_0 : i32, i32
  }
  func.func @transform_8(%arg0: i32, %arg1: i32) -> (i32, i32) {
    %c0_i32 = arith.constant 0 : i32
    %c0_i32_0 = arith.constant 0 : i32
    %c0_i32_1 = arith.constant 0 : i32
    return %c0_i32, %c0_i32_0 : i32, i32
  }
  func.func @transform_9(%arg0: i32, %arg1: i32) -> (i32, i32) {
    %c0_i32 = arith.constant 0 : i32
    %c0_i32_0 = arith.constant 0 : i32
    %c0_i32_1 = arith.constant 0 : i32
    return %c0_i32, %c0_i32_0 : i32, i32
  }
  func.func @transform_10(%arg0: i32, %arg1: i32) -> (i32, i32) {
    %c0_i32 = arith.constant 0 : i32
    %c0_i32_0 = arith.constant 0 : i32
    %c0_i32_1 = arith.constant 0 : i32
    return %c0_i32, %c0_i32_0 : i32, i32
  }
  func.func @transform_11(%arg0: i32, %arg1: i32) -> (i32, i32, i32) {
    %c0_i32 = arith.constant 0 : i32
    %c0_i32_0 = arith.constant 0 : i32
    %c0_i32_1 = arith.constant 0 : i32
    %c0_i32_2 = arith.constant 0 : i32
    return %c0_i32, %c0_i32_0, %c0_i32_1 : i32, i32, i32
  }
  func.func @transform_12(%arg0: i32, %arg1: i32) -> (i32, i32) {
    %c0_i32 = arith.constant 0 : i32
    %c0_i32_0 = arith.constant 0 : i32
    %c0_i32_1 = arith.constant 0 : i32
    return %c0_i32, %c0_i32_0 : i32, i32
  }
  func.func @transform_13(%arg0: i32, %arg1: i32) -> (i32, i32, i32) {
    %c0_i32 = arith.constant 0 : i32
    %c0_i32_0 = arith.constant 0 : i32
    return %arg0, %arg1, %c0_i32 : i32, i32, i32
  }
}

</mosaic_0001>

<bundles_post_ra>
// kernel: tpu_custom_call.1
= control target key start
LH: loop header
LB: loop body
LE: loop exit
PB: predicated region body
PF: predicated region fallthrough
CT: control target
= control target key end

     0   :  { %s2337_s25 = smov 0   ;;  %s2339_s26 = smov 0   ;;  %s2958_s0 = inlined_call_operand.vmem [shape: f32[2,64,32], index: 0, kind: input, shape index: {}]   ;;  %s2959_s1 = inlined_call_operand.vmem [shape: f32[2,64,32], index: 1, kind: input, shape index: {}]   ;;  %s2960_s2 = inlined_call_operand.vmem [shape: f32[2,8,16], index: 2, kind: input, shape index: {}]   ;;  %s2961_s3 = inlined_call_operand.vmem [shape: bf16[16,32], index: 3, kind: input, shape index: {}]   ;;  %s2962_s4 = inlined_call_operand.vmem [shape: f32[1,32], index: 4, kind: input, shape index: {}]   ;;  %s2963_s5 = inlined_call_operand.vmem [shape: bf16[32,32], index: 5, kind: input, shape index: {}]   ;;  %s2964_s6 = inlined_call_operand.vmem [shape: f32[1,32], index: 6, kind: input, shape index: {}]   ;;  %s2965_s7 = inlined_call_operand.vmem [shape: bf16[32,32], index: 7, kind: input, shape index: {}]   ;;  %s2966_s8 = inlined_call_operand.vmem [shape: f32[1,32], index: 8, kind: input, shape index: {}]   ;;  %s2967_s9 = inlined_call_operand.vmem [shape: bf16[32,32], index: 9, kind: input, shape index: {}]   ;;  %s2968_s10 = inlined_call_operand.vmem [shape: f32[1,32], index: 10, kind: input, shape index: {}]   ;;  %s2969_s11 = inlined_call_operand.vmem [shape: bf16[4,8,32], index: 11, kind: input, shape index: {}]   ;;  %s2970_s12 = inlined_call_operand.vmem [shape: f32[1,32], index: 12, kind: input, shape index: {}]   ;;  %s2971_s13 = inlined_call_operand.vmem [shape: f32[2,64,32], index: 13, kind: output, shape index: {}]  }
   0x1   :  { %s2341_s27 = smov 0   ;;  %s2343_s28 = smov 0  }
   0x2   :  { %s2345_s29 = smov 0  }
   0x3 LB: > { %s32_s30 = sadd.s32 1, %s2253_s27  ;;  %s35_s14 = sadd.s32 1, %s2257_s28  ;;  %s2261_s29 = sphi %s2345_s29, %s23_s29   ;;  %s2257_s28 = sphi %s2343_s28, %s2979_s28   ;;  %s2253_s27 = sphi %s2341_s27, %s2978_s27   ;;  %s2249_s26 = sphi %s2339_s26, %s2977_s26   ;;  %s2245_s25 = sphi %s2337_s25, %s2976_s25  }
   0x4   : > { %p33_p0 = scmp.ge.s32.totalorder %s32_s30, 2  ;;  %p1966_p1 = scmp.ge.s32.totalorder %s2261_s29, 1 }
   0x5   : > { %p427_p2 = scmp.lt.s32.totalorder %s2261_s29, 5 }
   0x6   : > { %s2981_s30 = smov (%p33_p0, %s32_s30), 0  ;;  %s2983_s14 = smov (!%p33_p0, %s35_s14), %s2257_s28 }
   0x7   : > { %p428_p3 = pnand %p1966_p1, %p427_p2  ;;  %p37_p4 = scmp.ge.s32.totalorder %s2983_s14, 2 }
   0x8   : > { %p489_p5 = scmp.lt.s32.totalorder (!%p428_p3), %s2249_s26, 1  ;;  %s1967_s19 = sshll.u32 (!%p428_p3), %s2245_s25, 2 }
   0x9   : > { %s2985_s14 = smov (%p37_p4, %s2983_s14), 0  ;;  %431 = sbr.rel (%p428_p3) target bundleno = 1999 (0x7cf), region = 72 }
   0xa   : > { %p491_p6 = scmp.lt.s32.totalorder (!%p428_p3), %s1967_s19, 7  ;;  %s2265_s24 = smov (!%p428_p3), 112  }
   0xe   : > { %s2987_s26 = smov (!%p489_p5, %s2249_s26), 1  ;;  %vm581_vm0 = vcmask 261120   ;;  %v2263_v14 = vmov 32.0   ;;  %s2989_s19 = smov (!%p491_p6, %s1967_s19), 7  ;;  %vm564_vm6 = vcmask 130048   ;;  %vm773_vm10 = vcmask 257024  }
   0xf   : > { %s2063_s15 = sshll.u32 %s2987_s26, 6  ;;  %2125 = vrcp.f32 %v2263_v14  ;;  %s1968_s20 = sshll.u32 %s2987_s26, 3 }
  0x10   : > { %s2375_s18 = scalar_lea.vmem %s2959_s1, %s2063_s15  ;;  %s2427_s21 = sadd.s32 %s1968_s20, %s2989_s19 }
  0x11   : > { %v526_v0 = vld [vmem:[%s2375_s18 + $0x20] sm:$0xff]  ;;  %v524_v1 = vld [vmem:[%s2375_s18 + $0x10] sm:$0xff]  ;;  %v527_v6 = vld [vmem:[%s2375_s18 + $0x28] sm:$0xff]  ;;  %s1969_s22 = sshll.u32 %s2427_s21, 3  ;;  %s506_s17 = scalar_lea.vmem %s2960_s2, %s1968_s20 }
  0x12   : > { %v522_v2 = vld [vmem:[%s2375_s18] sm:$0xff]  ;;  %v594_v3 = vsel %vm581_vm0, %v526_v0, 0.0  ;;  %v588_v4 = vsel %vm581_vm0, %v524_v1, 0.0  ;;  %v525_v7 = vld [vmem:[%s2375_s18 + $0x18] sm:$0xff]  ;;  %v523_v8 = vld [vmem:[%s2375_s18 + $0x8] sm:$0xff]  ;;  %v597_v9 = vsel %vm581_vm0, %v527_v6, 0.0  ;;  %s2449_s25 = scalar_lea.vmem %s2958_s0, %s1969_s22 }
  0x13   : > { %v582_v5 = vsel %vm581_vm0, %v522_v2, 0.0  ;;  %595 = vadd.xlane.f32.xlu2 %v594_v3  ;;  %589 = vadd.xlane.f32.xlu1 %v588_v4  ;;  %v591_v10 = vsel %vm581_vm0, %v525_v7, 0.0  ;;  %v585_v11 = vsel %vm581_vm0, %v523_v8, 0.0  ;;  %v528_v12 = vld [vmem:[%s2375_s18 + $0x30] sm:$0xff]  ;;  %v2407_v36 = vld [vmem:[%s2375_s18 + $0x38] sm:$0xff]  ;;  %v2454_v57 = vld [vmem:[%s2449_s25 + $0x8] sm:$0xff]  ;;  %s515_s18 = scalar_lea.vmem %s2971_s13, %s1969_s22 }
  0x14   : > { %583 = vadd.xlane.f32.xlu0 %v582_v5  ;;  %v600_v13 = vsel %vm581_vm0, %v528_v12, 0.0  ;;  %v603_v41 = vsel %vm581_vm0, %v2407_v36, 0.0  ;;  %v796_v58 = vsel %vm581_vm0, %v2454_v57, 0.0  ;;  %v2460_v60 = vld [vmem:[%s2449_s25] sm:$0xff]  ;;  %v2465_v62 = vld [vmem:[%s2449_s25 + $0x18] sm:$0xff]  ;;  %s2264_s19 = smov 120  }
  0x15   : > { %v2126_v15 = vpop.eup %2125  ;;  %v793_v61 = vsel %vm581_vm0, %v2460_v60, 0.0  ;;  %v802_v63 = vsel %vm581_vm0, %v2465_v62, 0.0  ;;  %s2266_s15 = smov 104  }
  0x16   : > { %v607_v16 = vmul.f32 32.0, %v2126_v15  ;;  %vm611_vm1 = vweird.f32 %v2126_v15 }
  0x18   : > { %v608_v17 = vsub.f32 1.0, %v607_v16  ;;  %v2074_v16 = vld [vmem:[%s2967_s9 + $0x8] sm:$0xff] }
  0x19   : > { %1058 = vmatpush.bf16.msra.mxu3 %v2074_v16 }
  0x1a   : > { %v609_v18 = vmul.f32 %v2126_v15, %v608_v17 }
  0x1b   : > { %598 = vadd.xlane.f32.xlu2 %v597_v9  ;;  %592 = vadd.xlane.f32.xlu1 %v591_v10 }
  0x1c   : > { %586 = vadd.xlane.f32.xlu0 %v585_v11  ;;  %v610_v19 = vadd.f32 %v2126_v15, %v609_v18  ;;  %v2064_v18 = vld [vmem:[%s2961_s3] sm:$0xff] }
  0x1d   : > { %575 = vmatpush.bf16.msra.mxu0 %v2064_v18 }
  0x1e   : > { %v2391_v20 = vsel %vm611_vm1, %v2126_v15, %v610_v19  ;;  %v2072_v15 = vld [vmem:[%s2965_s7 + $0x8] sm:$0xff] }
  0x1f   : > { %996 = vmatpush.bf16.msra.mxu2 %v2072_v15 }
  0x23   : > { %601 = vadd.xlane.f32.xlu2 %v600_v13 }
  0x86   : > { %v596_v21 = vpop.xlane.xlu2 %595  ;;  %v590_v22 = vpop.xlane.xlu1 %589 }
  0x87   : > { %v584_v23 = vpop.xlane.xlu0 %583  ;;  %v617_v32 = vmul.f32 %v2391_v20, %v596_v21  ;;  %v615_v33 = vmul.f32 %v2391_v20, %v590_v22 }
  0x88   : > { %v613_v24 = vmul.f32 %v2391_v20, %v584_v23 }
  0x89   : > { %v2413_v39 = vsub.f32 %v526_v0, %v617_v32  ;;  %v2415_v40 = vsub.f32 %v524_v1, %v615_v33  ;;  %v530_v0 = vld [vmem:[%s506_s17] sm:$0xff] }
  0x8a   : > { %v2394_v25 = vsub.f32 %v522_v2, %v613_v24  ;;  %v1976_v1 = vmul.f32 -1.442695, %v530_v0 }
  0x8b   : > { %v633_v48 = vmul.f32 %v2413_v39, %v2413_v39  ;;  %v631_v49 = vmul.f32 %v2415_v40, %v2415_v40 }
  0x8c   : > { %v629_v26 = vmul.f32 %v2394_v25, %v2394_v25  ;;  %2127 = vpow2.f32 %v1976_v1 }
  0x8d   : > { %v649_v53 = vsel %vm581_vm0, %v633_v48, 0.0  ;;  %v643_v54 = vsel %vm581_vm0, %v631_v49, 0.0 }
  0x8e   : > { %v599_v27 = vpop.xlane.xlu2 %598  ;;  %v593_v28 = vpop.xlane.xlu1 %592  ;;  %v637_v29 = vsel %vm581_vm0, %v629_v26, 0.0 }
  0x8f   : > { %v616_v30 = vmul.f32 %v2391_v20, %v593_v28  ;;  %638 = vadd.xlane.f32.xlu0 %v637_v29  ;;  %v587_v31 = vpop.xlane.xlu0 %586  ;;  %v618_v47 = vmul.f32 %v2391_v20, %v599_v27  ;;  %v2071_v28 = vld [vmem:[%s2965_s7] sm:$0xff] }
  0x90   : > { %v614_v34 = vmul.f32 %v2391_v20, %v587_v31  ;;  %v2073_v29 = vld [vmem:[%s2967_s9] sm:$0xff]  ;;  %997 = vmatpush.bf16.msra.mxu2 %v2071_v28 }
  0x91   : > { %v2404_v35 = vsub.f32 %v525_v7, %v616_v30  ;;  %v2439_v52 = vsub.f32 %v527_v6, %v618_v47  ;;  %1059 = vmatpush.bf16.msra.mxu3 %v2073_v29 }
  0x92   : > { %v2409_v37 = vsub.f32 %v523_v8, %v614_v34  ;;  %v2128_v2 = vpop.eup %2127 }
  0x93   : > { %v632_v38 = vmul.f32 %v2404_v35, %v2404_v35  ;;  %v634_v56 = vmul.f32 %v2439_v52, %v2439_v52  ;;  %v534_v3 = vadd.f32 1.0, %v2128_v2 }
  0x94   : > { %v630_v42 = vmul.f32 %v2409_v37, %v2409_v37 }
  0x95   : > { %v646_v43 = vsel %vm581_vm0, %v632_v38, 0.0  ;;  %v652_v59 = vsel %vm581_vm0, %v634_v56, 0.0  ;;  %2129 = vrcp.f32 %v534_v3  ;;  %v546_v10 = vand.u32 2147483648, %v534_v3  ;;  %v2505_v56 = vld [vmem:[%s2449_s25 + $0x10] sm:$0xff] }
  0x96   : > { %v602_v44 = vpop.xlane.xlu2 %601  ;;  %647 = vadd.xlane.f32.xlu2 %v646_v43  ;;  %v640_v45 = vsel %vm581_vm0, %v630_v42, 0.0  ;;  %vm540_vm2 = vweird.f32 %v534_v3 }
  0x97   : > { %v619_v46 = vmul.f32 %v2391_v20, %v602_v44  ;;  %604 = vadd.xlane.f32.xlu0 %v603_v41  ;;  %641 = vadd.xlane.f32.xlu1 %v640_v45  ;;  %v547_v14 = vor.u32 1.1754944e-38, %v546_v10 }
  0x99   : > { %v2434_v50 = vsub.f32 %v528_v12, %v619_v46  ;;  %v544_v12 = vand.u32 2147483647, %v534_v3 }
  0x9b   : > { %v635_v51 = vmul.f32 %v2434_v50, %v2434_v50  ;;  %v2130_v4 = vpop.eup %2129  ;;  %vm545_vm5 = vcmp.eq.f32.partialorder %v544_v12, 8.507059e+37 }
  0x9c   : > { %v536_v5 = vmul.f32 %v2130_v4, %v534_v3  ;;  %vm541_vm3 = vweird.f32 %v2130_v4  ;;  %v799_v3 = vsel %vm581_vm0, %v2505_v56, 0.0 }
  0x9d   : > { %v655_v55 = vsel %vm581_vm0, %v635_v51, 0.0  ;;  %vm542_vm4 = vmor %vm540_vm2, %vm541_vm3 }
  0x9e   : > { %656 = vadd.xlane.f32.xlu2 %v655_v55  ;;  %v537_v6 = vsub.f32 1.0, %v536_v5 }
  0x9f   : > { %650 = vadd.xlane.f32.xlu0 %v649_v53  ;;  %644 = vadd.xlane.f32.xlu1 %v643_v54 }
  0xa0   : > { %v538_v8 = vmul.f32 %v2130_v4, %v537_v6 }
  0xa2   : > { %v539_v11 = vadd.f32 %v2130_v4, %v538_v8 }
  0xa4   : > { %v543_v17 = vsel %vm542_vm4, %v2130_v4, %v539_v11 }
  0xa5   : > { %v548_v19 = vsel %vm545_vm5, %v547_v14, %v543_v17 }
  0xa6   : > { %797 = vadd.xlane.f32.xlu2 %v796_v58  ;;  %v550_v21 = vmul.f32 %v548_v19, %v530_v0 }
  0xa7   : > { %653 = vadd.xlane.f32.xlu1 %v652_v59 }
  0xa8   : > { %v551_v27 = vpack.c.bf16 %v550_v21, %v550_v21 }
  0xaa   : > { %1981 = vmatmul.msk.bf16.vlgmr.msra.gmra.mxu0 %vm564_vm6, %v551_v27 }
  0xaf   : > { %794 = vadd.xlane.f32.xlu1 %v793_v61 }
  0xb7   : > { %803 = vadd.xlane.f32.xlu1 %v802_v63 }
 0x102   : > { %v639_v7 = vpop.xlane.xlu0 %638 }
 0x103   : > { %v661_v9 = vmul.f32 %v639_v7, %v2391_v20 }
 0x105   : > { %v669_v13 = vadd.f32 1e-06, %v661_v9 }
 0x107   : > { %2131 = vrsqrt.f32 %v669_v13  ;;  %vm683_vm8 = vweird.f32 %v669_v13 }
 0x109   : > { %v648_v22 = vpop.xlane.xlu2 %647 }
 0x10a   : > { %v664_v23 = vmul.f32 %v648_v22, %v2391_v20  ;;  %v642_v24 = vpop.xlane.xlu1 %641  ;;  %v605_v26 = vpop.xlane.xlu0 %604 }
 0x10b   : > { %v662_v30 = vmul.f32 %v642_v24, %v2391_v20  ;;  %v620_v31 = vmul.f32 %v2391_v20, %v605_v26 }
 0x10c   : > { %v672_v32 = vadd.f32 1e-06, %v664_v23 }
 0x10d   : > { %v2132_v33 = vpop.eup %2131  ;;  %v670_v34 = vadd.f32 1e-06, %v662_v30  ;;  %v2494_v38 = vsub.f32 %v2407_v36, %v620_v31 }
 0x10e   : > { %v678_v41 = vmul.f32 %v2132_v33, %v669_v13  ;;  %2133 = vrsqrt.f32 %v672_v32  ;;  %vm684_vm7 = vweird.f32 %v2132_v33  ;;  %vm713_vm11 = vweird.f32 %v672_v32 }
 0x10f   : > { %2135 = vrsqrt.f32 %v670_v34  ;;  %v636_v42 = vmul.f32 %v2494_v38, %v2494_v38  ;;  %vm685_vm9 = vmor %vm683_vm8, %vm684_vm7  ;;  %vm693_vm13 = vweird.f32 %v670_v34 }
 0x110   : > { %v679_v43 = vmul.f32 %v2132_v33, %v678_v41 }
 0x111   : > { %v657_v44 = vpop.xlane.xlu2 %656  ;;  %v658_v45 = vsel %vm581_vm0, %v636_v42, 0.0 }
 0x112   : > { %v680_v46 = vmul.f32 0.5, %v679_v43  ;;  %v667_v47 = vmul.f32 %v657_v44, %v2391_v20  ;;  %v645_v48 = vpop.xlane.xlu1 %644  ;;  %659 = vadd.xlane.f32.xlu0 %v658_v45  ;;  %v651_v49 = vpop.xlane.xlu0 %650 }
 0x113   : > { %v663_v36 = vmul.f32 %v645_v48, %v2391_v20  ;;  %v665_v51 = vmul.f32 %v651_v49, %v2391_v20 }
 0x114   : > { %v2134_v53 = vpop.eup %2133  ;;  %v681_v54 = vsub.f32 1.5, %v680_v46  ;;  %v2502_v55 = vadd.f32 1e-06, %v667_v47 }
 0x115   : > { %v2136_v58 = vpop.eup %2135  ;;  %v708_v59 = vmul.f32 %v2134_v53, %v672_v32  ;;  %v2507_v61 = vadd.f32 1e-06, %v663_v36  ;;  %v2509_v63 = vadd.f32 1e-06, %v665_v51  ;;  %vm714_vm12 = vweird.f32 %v2134_v53 }
 0x116   : > { %v682_v0 = vmul.f32 %v2132_v33, %v681_v54  ;;  %v688_v1 = vmul.f32 %v2136_v58, %v670_v34  ;;  %2137 = vrsqrt.f32 %v2502_v55  ;;  %vm694_vm14 = vweird.f32 %v2136_v58  ;;  %vm2519_vm15 = vmor %vm713_vm11, %vm714_vm12 }
 0x117   : > { %v709_v2 = vmul.f32 %v2134_v53, %v708_v59  ;;  %2139 = vrsqrt.f32 %v2507_v61  ;;  %vm743_vm1 = vweird.f32 %v2502_v55  ;;  %vm2530_vm2 = vmor %vm693_vm13, %vm694_vm14  ;;  %vm703_vm3 = vweird.f32 %v2507_v61 }
 0x118   : > { %v686_v4 = vsel %vm685_vm9, %v2132_v33, %v682_v0  ;;  %v689_v5 = vmul.f32 %v2136_v58, %v688_v1  ;;  %2141 = vrsqrt.f32 %v2509_v63  ;;  %vm723_vm4 = vweird.f32 %v2509_v63 }
 0x119   : > { %v757_v6 = vmul.f32 %v686_v4, %v2394_v25  ;;  %v710_v7 = vmul.f32 0.5, %v709_v2  ;;  %v798_v8 = vpop.xlane.xlu2 %797 }
 0x11a   : > { %v690_v9 = vmul.f32 0.5, %v689_v5  ;;  %v654_v10 = vpop.xlane.xlu1 %653  ;;  %800 = vadd.xlane.f32.xlu0 %v799_v3  ;;  %v806_v11 = vmul.f32 %v798_v8, %v2391_v20 }
 0x11b   : > { %v765_v12 = vpack.c.bf16 %v757_v6, %v757_v6  ;;  %v711_v13 = vsub.f32 1.5, %v710_v7  ;;  %v666_v14 = vmul.f32 %v654_v10, %v2391_v20 }
 0x11c   : > { %v2138_v15 = vpop.eup %2137  ;;  %v691_v25 = vsub.f32 1.5, %v690_v9  ;;  %v2525_v17 = vsub.f32 %v2454_v57, %v806_v11 }
 0x11d   : > { %v2140_v18 = vpop.eup %2139  ;;  %774 = vst.msk [vmem:[#allocation2] sm:$0xf] %vm773_vm10, %v765_v12  ;;  %v712_v19 = vmul.f32 %v2134_v53, %v711_v13  ;;  %v738_v22 = vmul.f32 %v2138_v15, %v2502_v55  ;;  %v2536_v23 = vadd.f32 1e-06, %v666_v14  ;;  %vm744_vm5 = vweird.f32 %v2138_v15 }
 0x11e   : > { %v2142_v24 = vpop.eup %2141  ;;  %v692_v26 = vmul.f32 %v2136_v58, %v691_v25  ;;  %v698_v57 = vmul.f32 %v2140_v18, %v2507_v61  ;;  %v814_v27 = vmul.f32 %v2525_v17, %v2525_v17  ;;  %vm704_vm6 = vweird.f32 %v2140_v18  ;;  %vm745_vm8 = vmor %vm743_vm1, %vm744_vm5 }
 0x11f   : > { %v716_v28 = vsel %vm2519_vm15, %v2134_v53, %v712_v19  ;;  %v739_v29 = vmul.f32 %v2138_v15, %v738_v22  ;;  %v718_v30 = vmul.f32 %v2142_v24, %v2509_v63  ;;  %2143 = vrsqrt.f32 %v2536_v23  ;;  %vm705_vm9 = vmor %vm703_vm3, %vm704_vm6 }
 0x120   : > { %v760_v31 = vmul.f32 %v716_v28, %v2404_v35  ;;  %v696_v32 = vsel %vm2530_vm2, %v2136_v58, %v692_v26  ;;  %v699_v33 = vmul.f32 %v2140_v18, %v698_v57  ;;  %vm724_vm7 = vweird.f32 %v2142_v24 }
 0x121   : > { %v758_v34 = vmul.f32 %v696_v32, %v2409_v37  ;;  %v740_v41 = vmul.f32 0.5, %v739_v29  ;;  %v719_v42 = vmul.f32 %v2142_v24, %v718_v30  ;;  %v820_v45 = vsel %vm581_vm0, %v814_v27, 0.0  ;;  %vm725_vm11 = vmor %vm723_vm4, %vm724_vm7  ;;  %v2070_v30 = vld [vmem:[%s2963_s5 + $0x8] sm:$0xff] }
 0x122   : > { %v768_v43 = vpack.c.bf16 %v760_v31, %v760_v31  ;;  %v700_v44 = vmul.f32 0.5, %v699_v33  ;;  %v795_v46 = vpop.xlane.xlu1 %794  ;;  %821 = vadd.xlane.f32.xlu0 %v820_v45  ;;  %vm733_vm12 = vweird.f32 %v2536_v23  ;;  %915 = vmatpush.bf16.msra.mxu1 %v2070_v30 }
 0x123   : > { %v766_v47 = vpack.c.bf16 %v758_v34, %v758_v34  ;;  %v741_v48 = vsub.f32 1.5, %v740_v41  ;;  %v720_v35 = vmul.f32 0.5, %v719_v42  ;;  %v805_v49 = vmul.f32 %v795_v46, %v2391_v20  ;;  %v2069_v42 = vld [vmem:[%s2963_s5] sm:$0xff] }
 0x124   : > { %777 = vst.msk [vmem:[#allocation2 + $0xc] sm:$0xf] %vm773_vm10, %v768_v43  ;;  %v701_v37 = vsub.f32 1.5, %v700_v44 }
 0x125   : > { %775 = vst.msk [vmem:[#allocation2 + $0x4] sm:$0xf] %vm773_vm10, %v766_v47  ;;  %v742_v36 = vmul.f32 %v2138_v15, %v741_v48  ;;  %v721_v51 = vsub.f32 1.5, %v720_v35  ;;  %v2561_v53 = vsub.f32 %v2460_v60, %v805_v49  ;;  %v2144_v54 = vpop.eup %2143 }
 0x126   : > { %v702_v58 = vmul.f32 %v2140_v18, %v701_v37  ;;  %v728_v0 = vmul.f32 %v2144_v54, %v2536_v23  ;;  %vm734_vm13 = vweird.f32 %v2144_v54  ;;  %916 = vmatpush.bf16.msra.mxu1 %v2069_v42 }
 0x127   : > { %v746_v55 = vsel %vm745_vm8, %v2138_v15, %v742_v36  ;;  %v722_v59 = vmul.f32 %v2142_v24, %v721_v51  ;;  %v813_v61 = vmul.f32 %v2561_v53, %v2561_v53  ;;  %vm735_vm14 = vmor %vm733_vm12, %vm734_vm13  ;;  %v577_v23 = vpop.f32.mrf.mxu0 }
 0x128   : > { %v763_v1 = vmul.f32 %v746_v55, %v2434_v50  ;;  %v706_v2 = vsel %vm705_vm9, %v2140_v18, %v702_v58  ;;  %v729_v4 = vmul.f32 %v2144_v54, %v728_v0 }
 0x129   : > { %v759_v3 = vmul.f32 %v706_v2, %v2415_v40  ;;  %v726_v60 = vsel %vm725_vm11, %v2142_v24, %v722_v59  ;;  %v817_v63 = vsel %vm581_vm0, %v813_v61, 0.0 }
 0x12a   : > { %v771_v5 = vpack.c.bf16 %v763_v1, %v763_v1  ;;  %v761_v6 = vmul.f32 %v726_v60, %v2413_v39  ;;  %v804_v7 = vpop.xlane.xlu1 %803  ;;  %v730_v9 = vmul.f32 0.5, %v729_v4  ;;  %818 = vadd.xlane.f32.xlu2 %v817_v63 }
 0x12b   : > { %v767_v8 = vpack.c.bf16 %v759_v3, %v759_v3  ;;  %v808_v50 = vmul.f32 %v804_v7, %v2391_v20 }
 0x12c   : > { %780 = vst.msk [vmem:[#allocation2 + $0x18] sm:$0xf] %vm773_vm10, %v771_v5  ;;  %v769_v10 = vpack.c.bf16 %v761_v6, %v761_v6  ;;  %v2065_v40 = vld [vmem:[#allocation2] sm:$0xff]  ;;  %v731_v11 = vsub.f32 1.5, %v730_v9 }
 0x12d   : > { %776 = vst.msk [vmem:[#allocation2 + $0x8] sm:$0xf] %vm773_vm10, %v767_v8  ;;  %v2578_v39 = vsub.f32 %v2465_v62, %v808_v50  ;;  %2016 = vmatmul.msk.bf16.vlgmr.msra.gmra.mxu2 %vm581_vm0, %v2065_v40  ;;  %2029 = vmatmul.msk.bf16.vlgmr.msra.gmra.mxu3 %vm581_vm0, %v2065_v40  ;;  %v2621_v9 = vld [vmem:[%s2966_s8] ss:$0 sm:$0xff] }
 0x12e   : > { %778 = vst.msk [vmem:[#allocation2 + $0x10] sm:$0xf] %vm773_vm10, %v769_v10  ;;  %v732_v12 = vmul.f32 %v2144_v54, %v731_v11  ;;  %v2626_v50 = vld [vmem:[%s2968_s10] ss:$0 sm:$0xff] }
 0x12f   : > { %v816_v13 = vmul.f32 %v2578_v39, %v2578_v39  ;;  %v579_v32 = vpop.f32.mrf.mxu0 }
 0x130   : > { %v736_v14 = vsel %vm735_vm14, %v2144_v54, %v732_v12 }
 0x131   : > { %v826_v15 = vsel %vm581_vm0, %v816_v13, 0.0  ;;  %v762_v16 = vmul.f32 %v736_v14, %v2439_v52  ;;  %v2120_v52 = vld [vmem:[%s2962_s4] ss:$0 sm:$0xff] }
 0x132   : > { %827 = vadd.xlane.f32.xlu2 %v826_v15  ;;  %v578_v24 = vadd.f32 %v2120_v52, %v577_v23 }
 0x133   : > { %v770_v62 = vpack.c.bf16 %v762_v16, %v762_v16 }
 0x134   : > { %v2066_v25 = vld [vmem:[#allocation2 + $0x8] sm:$0xff]  ;;  %v782_v26 = vpack.c.bf16 %v578_v24, %v578_v24 }
 0x135   : > { %779 = vst.msk [vmem:[#allocation2 + $0x14] sm:$0xf] %vm773_vm10, %v770_v62 }
 0x136   : > { %783 = vst.msk [vmem:[#allocation2 + $0x20] sm:$0xf] %vm773_vm10, %v782_v26 }
 0x13c   : > { %v2067_v18 = vld [vmem:[#allocation2 + $0x10] sm:$0xff] }
 0x13d   : > { %2017 = vmatmul.msk.bf16.gmra.mxu2 %vm581_vm0, %v2066_v25  ;;  %2030 = vmatmul.msk.bf16.gmra.mxu3 %vm581_vm0, %v2066_v25  ;;  %v792_v4 = vld [vmem:[#allocation2 + $0x20] sm:$0xf] }
 0x13e   : > { %v957_v7 = vunpack.c.l.b16 %v792_v4 }
 0x140   : > { %v962_v13 = vpack.c.b16 %v957_v7, %v957_v7 }
 0x14d   : > { %2018 = vmatmul.msk.bf16.gmra.mxu2 %vm581_vm0, %v2067_v18  ;;  %2031 = vmatmul.msk.bf16.gmra.mxu3 %vm581_vm0, %v2067_v18 }
 0x185   : > { %v660_v19 = vpop.xlane.xlu0 %659 }
 0x186   : > { %v668_v21 = vmul.f32 %v660_v19, %v2391_v20 }
 0x188   : > { %v676_v22 = vadd.f32 1e-06, %v668_v21 }
 0x18a   : > { %2145 = vrsqrt.f32 %v676_v22  ;;  %vm753_vm1 = vweird.f32 %v676_v22 }
 0x18d   : > { %v801_v57 = vpop.xlane.xlu0 %800 }
 0x18e   : > { %v807_v27 = vmul.f32 %v801_v57, %v2391_v20 }
 0x190   : > { %v2146_v28 = vpop.eup %2145  ;;  %v2601_v29 = vsub.f32 %v2505_v56, %v807_v27 }
 0x191   : > { %v748_v31 = vmul.f32 %v2146_v28, %v676_v22  ;;  %vm754_vm15 = vweird.f32 %v2146_v28 }
 0x192   : > { %v815_v33 = vmul.f32 %v2601_v29, %v2601_v29  ;;  %vm755_vm2 = vmor %vm753_vm1, %vm754_vm15  ;;  %vm1240_vm15 = vcmask 1043456   ;;  %vm1127_vm1 = vcmask 64512  }
 0x193   : > { %v749_v34 = vmul.f32 %v2146_v28, %v748_v31 }
 0x194   : > { %v823_v41 = vsel %vm581_vm0, %v815_v33, 0.0 }
 0x195   : > { %v750_v43 = vmul.f32 0.5, %v749_v34  ;;  %824 = vadd.xlane.f32.xlu1 %v823_v41  ;;  %v822_v56 = vpop.xlane.xlu0 %821 }
 0x196   : > { %v830_v45 = vmul.f32 %v822_v56, %v2391_v20 }
 0x197   : > { %v751_v44 = vsub.f32 1.5, %v750_v43 }
 0x198   : > { %v834_v47 = vadd.f32 1e-06, %v830_v45 }
 0x199   : > { %v752_v46 = vmul.f32 %v2146_v28, %v751_v44 }
 0x19a   : > { %2147 = vrsqrt.f32 %v834_v47  ;;  %vm853_vm3 = vweird.f32 %v834_v47 }
 0x19b   : > { %v756_v48 = vsel %vm755_vm2, %v2146_v28, %v752_v46  ;;  %vm1168_vm2 = vcmask 588800  }
 0x19c   : > { %v764_v35 = vmul.f32 %v756_v48, %v2494_v38 }
 0x19d   : > { %v819_v37 = vpop.xlane.xlu2 %818 }
 0x19e   : > { %v772_v49 = vpack.c.bf16 %v764_v35, %v764_v35  ;;  %v829_v36 = vmul.f32 %v819_v37, %v2391_v20 }
 0x1a0   : > { %781 = vst.msk [vmem:[#allocation2 + $0x1c] sm:$0xf] %vm773_vm10, %v772_v49  ;;  %v2148_v51 = vpop.eup %2147  ;;  %v833_v54 = vadd.f32 1e-06, %v829_v36 }
 0x1a1   : > { %v848_v58 = vmul.f32 %v2148_v51, %v834_v47  ;;  %vm854_vm4 = vweird.f32 %v2148_v51 }
 0x1a2   : > { %2149 = vrsqrt.f32 %v833_v54  ;;  %vm843_vm10 = vweird.f32 %v833_v54  ;;  %vm855_vm6 = vmor %vm853_vm3, %vm854_vm4 }
 0x1a3   : > { %v849_v55 = vmul.f32 %v2148_v51, %v848_v58 }
 0x1a5   : > { %v850_v59 = vmul.f32 0.5, %v849_v55  ;;  %v828_v28 = vpop.xlane.xlu2 %827 }
 0x1a6   : > { %v832_v30 = vmul.f32 %v828_v28, %v2391_v20 }
 0x1a7   : > { %v2068_v0 = vld [vmem:[#allocation2 + $0x18] sm:$0xff]  ;;  %v851_v2 = vsub.f32 1.5, %v850_v59 }
 0x1a8   : > { %v2150_v1 = vpop.eup %2149  ;;  %2019 = vmatmul.msk.bf16.gmra.mxu2 %vm581_vm0, %v2068_v0  ;;  %2032 = vmatmul.msk.bf16.gmra.mxu3 %vm581_vm0, %v2068_v0  ;;  %v836_v31 = vadd.f32 1e-06, %v832_v30 }
 0x1a9   : > { %v838_v38 = vmul.f32 %v2150_v1, %v833_v54  ;;  %v852_v3 = vmul.f32 %v2148_v51, %v851_v2  ;;  %vm844_vm5 = vweird.f32 %v2150_v1 }
 0x1aa   : > { %vm845_vm7 = vmor %vm843_vm10, %vm844_vm5  ;;  %2151 = vrsqrt.f32 %v836_v31  ;;  %vm873_vm8 = vweird.f32 %v836_v31 }
 0x1ab   : > { %v839_v61 = vmul.f32 %v2150_v1, %v838_v38  ;;  %v856_v10 = vsel %vm855_vm6, %v2148_v51, %v852_v3 }
 0x1ac   : > { %v878_v12 = vmul.f32 %v856_v10, %v2525_v17 }
 0x1ad   : > { %v840_v60 = vmul.f32 0.5, %v839_v61 }
 0x1af   : > { %v841_v5 = vsub.f32 1.5, %v840_v60 }
 0x1b0   : > { %v999_v6 = vpop.f32.mrf.mxu2  ;;  %v1061_v63 = vpop.f32.mrf.mxu3 }
 0x1b1   : > { %v842_v8 = vmul.f32 %v2150_v1, %v841_v5  ;;  %v1000_v14 = vadd.f32 %v2621_v9, %v999_v6  ;;  %v1062_v15 = vadd.f32 %v2626_v50, %v1061_v63  ;;  %v2152_v32 = vpop.eup %2151 }
 0x1b2   : > { %v868_v41 = vmul.f32 %v2152_v32, %v836_v31  ;;  %vm874_vm9 = vweird.f32 %v2152_v32 }
 0x1b3   : > { %v846_v40 = vsel %vm845_vm7, %v2150_v1, %v842_v8  ;;  %v1023_v18 = vpack.c.bf16 %v1000_v14, %v1000_v14  ;;  %v1085_v19 = vpack.c.bf16 %v1062_v15, %v1062_v15  ;;  %vm875_vm11 = vmor %vm873_vm8, %vm874_vm9 }
 0x1b4   : > { %v877_v11 = vmul.f32 %v846_v40, %v2561_v53  ;;  %v869_v44 = vmul.f32 %v2152_v32, %v868_v41 }
 0x1b5   : > { %v1113_v52 = vunpack.c.l.b16 %v1023_v18  ;;  %v1216_v23 = vunpack.c.l.b16 %v1085_v19 }
 0x1b6   : > { %v881_v16 = vpack.c.bf16 %v878_v12, %v877_v11  ;;  %v870_v45 = vmul.f32 0.5, %v869_v44 }
 0x1b8   : > { %1990 = vmatmul.msk.bf16.vlgmr.msra.gmra.mxu1 %vm581_vm0, %v881_v16  ;;  %v1001_v62 = vpop.f32.mrf.mxu2  ;;  %2020 = vmatmul.msk.bf16.gmra.mxu2 %vm581_vm0, %v962_v13  ;;  %v1063_v25 = vpop.f32.mrf.mxu3  ;;  %v871_v35 = vsub.f32 1.5, %v870_v45 }
 0x1b9   : > { %v1002_v21 = vadd.f32 %v2621_v9, %v1001_v62  ;;  %v1064_v53 = vadd.f32 %v2626_v50, %v1063_v25  ;;  %2033 = vmatmul.msk.bf16.gmra.mxu3 %vm581_vm0, %v962_v13 }
 0x1ba   : > { %v872_v36 = vmul.f32 %v2152_v32, %v871_v35 }
 0x1bb   : > { %v1024_v17 = vpack.c.bf16 %v1002_v21, %v1002_v21  ;;  %v1086_v22 = vpack.c.bf16 %v1064_v53, %v1064_v53 }
 0x1bc   : > { %v876_v59 = vsel %vm875_vm11, %v2152_v32, %v872_v36 }
 0x1bd   : > { %v1114_v24 = vunpack.c.l.b16 %v1024_v17  ;;  %v1217_v26 = vunpack.c.l.b16 %v1086_v22  ;;  %v880_v2 = vmul.f32 %v876_v59, %v2578_v39 }
 0x1bf   : > { %v2637_v57 = vpack.c.b16 %v1114_v24, %v1113_v52  ;;  %v2639_v27 = vpack.c.b16 %v1217_v26, %v1216_v23 }
 0x1c0   : > { %v1004_v33 = vpop.f32.mrf.mxu2  ;;  %v2642_v34 = vpop.f32.mrf.mxu3 }
 0x1c1   : > { %v1005_v19 = vadd.f32 %v2621_v9, %v1004_v33 }
 0x1c3   : > { %v1025_v30 = vpack.c.bf16 %v1005_v19, %v1005_v19 }
 0x1c8   : > { %v1006_v46 = vpop.f32.mrf.mxu2  ;;  %v1068_v47 = vpop.f32.mrf.mxu3 }
 0x1c9   : > { %v1007_v16 = vadd.f32 %v2621_v9, %v1006_v46  ;;  %v1069_v31 = vadd.f32 %v2626_v50, %v1068_v47  ;;  %v1067_v47 = vadd.f32 %v2626_v50, %v2642_v34 }
 0x1cb   : > { %v1026_v52 = vpack.c.bf16 %v1007_v16, %v1007_v16 }
 0x1d0   : > { %v2645_v54 = vpop.f32.mrf.mxu2  ;;  %v1071_v58 = vpop.f32.mrf.mxu3 }
 0x1d1   : > { %v1072_v24 = vadd.f32 %v2626_v50, %v1071_v58  ;;  %v1115_v58 = vunpack.c.l.b16 %v1025_v30 }
 0x1d8   : > { %v1011_v61 = vpop.f32.mrf.mxu2  ;;  %v1073_v3 = vpop.f32.mrf.mxu3 }
 0x1d9   : > { %v1074_v53 = vadd.f32 %v2626_v50, %v1073_v3 }
 0x208   : > { %v825_v42 = vpop.xlane.xlu1 %824 }
 0x209   : > { %v831_v43 = vmul.f32 %v825_v42, %v2391_v20  ;;  %v1012_v42 = vadd.f32 %v2621_v9, %v1011_v61 }
 0x20b   : > { %v835_v56 = vadd.f32 1e-06, %v831_v43  ;;  %v1090_v43 = vpack.c.bf16 %v1074_v53, %v1074_v53 }
 0x20d   : > { %2153 = vrsqrt.f32 %v835_v56  ;;  %vm863_vm13 = vweird.f32 %v835_v56  ;;  %v1221_v59 = vunpack.c.l.b16 %v1090_v43 }
 0x213   : > { %v2154_v48 = vpop.eup %2153 }
 0x214   : > { %v858_v49 = vmul.f32 %v2154_v48, %v835_v56  ;;  %vm864_vm12 = vweird.f32 %v2154_v48  ;;  %v2123_v56 = vld [vmem:[%s2964_s6] ss:$0 sm:$0xff] }
 0x215   : > { %vm865_vm14 = vmor %vm863_vm13, %vm864_vm12 }
 0x216   : > { %v859_v37 = vmul.f32 %v2154_v48, %v858_v49  ;;  %v1010_v49 = vadd.f32 %v2621_v9, %v2645_v54 }
 0x218   : > { %v860_v51 = vmul.f32 0.5, %v859_v37  ;;  %v1089_v37 = vpack.c.bf16 %v1072_v24, %v1072_v24 }
 0x21a   : > { %v861_v55 = vsub.f32 1.5, %v860_v51 }
 0x21c   : > { %v862_v20 = vmul.f32 %v2154_v48, %v861_v55  ;;  %v1088_v55 = vpack.c.bf16 %v1069_v31, %v1069_v31 }
 0x21e   : > { %v866_v0 = vsel %vm865_vm14, %v2154_v48, %v862_v20  ;;  %v1116_v48 = vunpack.c.l.b16 %v1026_v52  ;;  %v1028_v20 = vpack.c.bf16 %v1012_v42, %v1012_v42 }
 0x21f   : > { %v879_v1 = vmul.f32 %v866_v0, %v2601_v29 }
 0x220   : > { %v2685_v34 = vpack.c.b16 %v1116_v48, %v1115_v58  ;;  %v1118_v54 = vunpack.c.l.b16 %v1028_v20 }
 0x221   : > { %v882_v38 = vpack.c.bf16 %v880_v2, %v879_v1  ;;  %v1027_v2 = vpack.c.bf16 %v1010_v49, %v1010_v49 }
 0x223   : > { %1991 = vmatmul.msk.bf16.gmra.mxu1 %vm581_vm0, %v882_v38  ;;  %v1220_v38 = vunpack.c.l.b16 %v1089_v37 }
 0x225   : > { %v2688_v3 = vpack.c.b16 %v1221_v59, %v1220_v38 }
 0x22b   : > { %v1014_v60 = vpop.f32.mrf.mxu2  ;;  %v1076_v4 = vpop.f32.mrf.mxu3 }
 0x22c   : > { %v1015_v5 = vadd.f32 %v2621_v9, %v1014_v60  ;;  %v1077_v25 = vadd.f32 %v2626_v50, %v1076_v4 }
 0x22e   : > { %v1029_v7 = vpack.c.bf16 %v1015_v5, %v1015_v5  ;;  %v1091_v26 = vpack.c.bf16 %v1077_v25, %v1077_v25 }
 0x230   : > { %v1119_v40 = vunpack.c.l.b16 %v1029_v7  ;;  %v1222_v36 = vunpack.c.l.b16 %v1091_v26 }
 0x233   : > { %v1016_v6 = vpop.f32.mrf.mxu2  ;;  %v1078_v63 = vpop.f32.mrf.mxu3 }
 0x234   : > { %v1017_v8 = vadd.f32 %v2621_v9, %v1016_v6  ;;  %v1079_v13 = vadd.f32 %v2626_v50, %v1078_v63  ;;  %v1117_v6 = vunpack.c.l.b16 %v1027_v2 }
 0x235   : > { %v918_v29 = vpop.f32.mrf.mxu1 }
 0x236   : > { %v1030_v10 = vpack.c.bf16 %v1017_v8, %v1017_v8  ;;  %v1092_v17 = vpack.c.bf16 %v1079_v13, %v1079_v13  ;;  %v919_v0 = vadd.f32 %v2123_v56, %v918_v29  ;;  %v2697_v8 = vpack.c.b16 %v1118_v54, %v1117_v6 }
 0x237   : > { %v1138_v29 = vsel %vm1127_vm1, %v2685_v34, 0 }
 0x238   : > { %v1120_v11 = vunpack.c.l.b16 %v1030_v10  ;;  %v1223_v44 = vunpack.c.l.b16 %v1092_v17  ;;  %v928_v60 = vpack.c.bf16 %v919_v0, %v919_v0 }
 0x23a   : > { %v2652_v12 = vpack.c.b16 %v1120_v11, %v1119_v40  ;;  %v2683_v1 = vpack.c.b16 %v1223_v44, %v1222_v36  ;;  %v1098_v10 = vunpack.c.l.b16 %v928_v60  ;;  %v1141_v11 = vsel %vm1127_vm1, %v2697_v8, 0 }
 0x23b   : > { %v1019_v39 = vpop.f32.mrf.mxu2 }
 0x23c   : > { %v1020_v14 = vadd.f32 %v2621_v9, %v1019_v39  ;;  %v1081_v15 = vpop.f32.mrf.mxu3  ;;  %1284 = vrot.lane.b32.xlu0 %v2652_v12, %s2264_s19  ;;  %v1219_v9 = vunpack.c.l.b16 %v1088_v55  ;;  %v1144_v4 = vsel %vm1127_vm1, %v2652_v12, 0  ;;  %v1135_v39 = vsel %vm1127_vm1, %v2637_v57, 0 }
 0x23d   : > { %v1082_v62 = vadd.f32 %v2626_v50, %v1081_v15  ;;  %v920_v32 = vpop.f32.mrf.mxu1  ;;  %v1087_v50 = vpack.c.bf16 %v1067_v47, %v1067_v47 }
 0x23e   : > { %v1031_v18 = vpack.c.bf16 %v1020_v14, %v1020_v14  ;;  %v921_v51 = vadd.f32 %v2123_v56, %v920_v32 }
 0x23f   : > { %v1093_v21 = vpack.c.bf16 %v1082_v62, %v1082_v62  ;;  %v1218_v5 = vunpack.c.l.b16 %v1087_v50 }
 0x240   : > { %v1121_v22 = vunpack.c.l.b16 %v1031_v18  ;;  %v929_v61 = vpack.c.bf16 %v921_v51, %v921_v51 }
 0x241   : > { %v1224_v23 = vunpack.c.l.b16 %v1093_v21  ;;  %v2695_v7 = vpack.c.b16 %v1219_v9, %v1218_v5 }
 0x242   : > { %v2664_v28 = vpack.c.b16 %v1121_v22, %v1121_v22  ;;  %v1099_v63 = vunpack.c.l.b16 %v929_v61 }
 0x243   : > { %v2667_v41 = vpack.c.b16 %v1224_v23, %v1224_v23  ;;  %v1021_v33 = vpop.f32.mrf.mxu2 }
 0x244   : > { %1286 = vrot.lane.b32.xlu2 %v2664_v28, %s2264_s19  ;;  %v1147_v45 = vsel %vm1127_vm1, %v2664_v28, 0  ;;  %v1083_v46 = vpop.f32.mrf.mxu3  ;;  %v2699_v40 = vpack.c.b16 %v1099_v63, %v1098_v10 }
 0x245   : > { %1152 = vmatpush.bf16.xpose.msrb.mxu0 %v1147_v45  ;;  %v1242_v35 = vsel %vm1240_vm15, %v2667_v41, 0 }
 0x246   : > { %1247 = vmatpush.bf16.msrb.mxu1 %v1242_v35 }
 0x24a   : > { %1248 = vmatpush.bf16.msrb.mxu1 %v2683_v1 }
 0x24c   : > { %1280 = vrot.lane.b32.xlu2 %v2685_v34, %s2264_s19 }
 0x24d   : > { %1153 = vmatpush.bf16.xpose.msrb.mxu0 %v1144_v4 }
 0x24e   : > { %1249 = vmatpush.bf16.msrb.mxu1 %v2688_v3 }
 0x252   : > { %1250 = vmatpush.bf16.msrb.mxu1 %v2695_v7 }
 0x254   : > { %1274 = vrot.lane.b32.xlu2 %v2699_v40, %s2264_s19 }
 0x255   : > { %1154 = vmatpush.bf16.xpose.msrb.mxu0 %v1141_v11 }
 0x256   : > { %1251 = vmatpush.bf16.msrb.mxu1 %v2639_v27 }
 0x25c   : > { %1374 = vrot.lane.b32.xlu2 %v2667_v41, %s2264_s19 }
 0x25d   : > { %1155 = vmatpush.bf16.xpose.msrb.mxu0 %v1138_v29 }
 0x265   : > { %1156 = vmatpush.bf16.xpose.msrb.mxu0 %v1135_v39 }
 0x26c   : > { %2034 = vmatmul.msk.bf16.vlgmr.msrb.gmra.mxu0 %vm1127_vm1, %v2699_v40 }
 0x29e   : > { %v1287_v13 = vpop.permute.xlu2 %1286 }
 0x29f   : > { %v1307_v14 = vsel %vm1127_vm1, %v1287_v13, 0 }
 0x2a0   : > { %v923_v15 = vpop.f32.mrf.mxu1  ;;  %1312 = vmatpush.bf16.xpose.msra.mxu1 %v1307_v14 }
 0x2a1   : > { %v924_v16 = vadd.f32 %v2123_v56, %v923_v15 }
 0x2a3   : > { %v930_v18 = vpack.c.bf16 %v924_v16, %v924_v16 }
 0x2a5   : > { %v1100_v53 = vunpack.c.l.b16 %v930_v18 }
 0x2a6   : > { %v2716_v62 = vpop.permute.xlu2 %1280 }
 0x2a8   : > { %v925_v25 = vpop.f32.mrf.mxu1 }
 0x2a9   : > { %v926_v19 = vadd.f32 %v2123_v56, %v925_v25 }
 0x2ab   : > { %v931_v21 = vpack.c.bf16 %v926_v19, %v926_v19 }
 0x2ad   : > { %v1101_v17 = vunpack.c.l.b16 %v931_v21 }
 0x2ae   : > { %v1285_v52 = vpop.permute.xlu0 %1284  ;;  %v2720_v23 = vpop.permute.xlu2 %1274 }
 0x2af   : > { %v2718_v22 = vpack.c.b16 %v1101_v17, %v1100_v53  ;;  %v1304_v24 = vsel %vm1127_vm1, %v1285_v52, 0  ;;  %v1298_v53 = vsel %vm1127_vm1, %v2716_v62, 0  ;;  %v1273_v52 = vld [vmem:[%s2969_s11] sm:$0xf] }
 0x2b0   : > { %1313 = vmatpush.bf16.xpose.msra.mxu1 %v1304_v24  ;;  %v1455_v24 = vsel %vm1240_vm15, %v1273_v52, 0 }
 0x2b1   : > { %2035 = vmatmul.msk.bf16.gmra.mxu0 %vm1127_vm1, %v2718_v22  ;;  %1464 = vmatpush.bf16.msrb.mxu3 %v1455_v24 }
 0x2b6   : > { %v1375_v26 = vpop.permute.xlu2 %1374 }
 0x2b7   : > { %v1387_v30 = vsel %vm1240_vm15, %v1375_v26, 0 }
 0x2b8   : > { %1392 = vmatpush.bf16.msra.mxu0 %v1387_v30 }
 0x2e9   : > { %v1158_v31 = vpop.f32.mrf.mxu0 }
 0x2ea   : > { %v1169_v32 = vsel %vm1168_vm2, %v1158_v31, -inf }
 0x2eb   : > { %1170 = vmax.xlane.f32.xlu0 %v1169_v32 }
 0x2f1   : > { %v1160_v33 = vpop.f32.mrf.mxu0 }
 0x2f2   : > { %v1172_v42 = vsel %vm1168_vm2, %v1160_v33, -inf }
 0x2f3   : > { %1173 = vmax.xlane.f32.xlu1 %v1172_v42 }
 0x2ff   : > { %1278 = vrot.lane.b32.xlu0 %v2637_v57, %s2264_s19 }
 0x307   : > { %1276 = vrot.lane.b32.xlu0 %v2718_v22, %s2264_s19 }
 0x30f   : > { %1372 = vrot.lane.b32.xlu0 %v2683_v1, %s2264_s19 }
 0x317   : > { %1370 = vrot.lane.b32.xlu0 %v2688_v3, %s2264_s19 }
 0x31f   : > { %1488 = vrot.lane.b32.xlu0 %v2664_v28, %s2265_s24 }
 0x327   : > { %1368 = vrot.lane.b32.xlu0 %v2695_v7, %s2264_s19 }
 0x32e   : > { %v1163_v43 = vpop.f32.mrf.mxu0 }
 0x32f   : > { %v1175_v56 = vsel %vm1168_vm2, %v1163_v43, -inf  ;;  %1366 = vrot.lane.b32.xlu0 %v2639_v27, %s2264_s19 }
 0x330   : > { %1176 = vmax.xlane.f32.xlu1 %v1175_v56 }
 0x336   : > { %v1165_v44 = vpop.f32.mrf.mxu0 }
 0x337   : > { %v1178_v45 = vsel %vm1168_vm2, %v1165_v44, -inf  ;;  %1486 = vrot.lane.b32.xlu0 %v2652_v12, %s2265_s24 }
 0x338   : > { %1179 = vmax.xlane.f32.xlu1 %v1178_v45 }
 0x33f   : > { %1484 = vrot.lane.b32.xlu0 %v2697_v8, %s2265_s24 }
 0x347   : > { %1482 = vrot.lane.b32.xlu0 %v2685_v34, %s2265_s24 }
 0x34f   : > { %1664 = vrot.lane.b32.xlu0 %v2652_v12, %s2266_s15 }
 0x351   : > { %1282 = vrot.lane.b32.xlu1 %v2697_v8, %s2264_s19 }
 0x35e   : > { %v1171_v46 = vpop.xlane.xlu0 %1170 }
 0x35f   : > { %v1181_v47 = vsub.f32 %v1158_v31, %v1171_v46 }
 0x361   : > { %v1185_v48 = vmul.f32 1.442695, %v1181_v47 }
 0x363   : > { %2155 = vpow2.f32 %v1185_v48 }
 0x366   : > { %v1174_v35 = vpop.xlane.xlu1 %1173 }
 0x367   : > { %v1182_v49 = vsub.f32 %v1160_v33, %v1174_v35 }
 0x369   : > { %v2156_v37 = vpop.eup %2155  ;;  %v1187_v36 = vmul.f32 1.442695, %v1182_v49 }
 0x36a   : > { %v1193_v51 = vsel %vm1168_vm2, %v2156_v37, 0.0 }
 0x36b   : > { %2157 = vpow2.f32 %v1187_v36  ;;  %1194 = vadd.xlane.f32.xlu2 %v1193_v51 }
 0x371   : > { %v2158_v58 = vpop.eup %2157  ;;  %v1279_v55 = vpop.permute.xlu0 %1278 }
 0x372   : > { %v1205_v20 = vpack.c.bf16 %v2158_v58, %v2156_v37  ;;  %v1196_v59 = vsel %vm1168_vm2, %v2158_v58, 0.0  ;;  %v1295_v17 = vsel %vm1127_vm1, %v1279_v55, 0 }
 0x374   : > { %2036 = vmatmul.msk.bf16.vlgmr.msrb.gmra.mxu1 %vm1168_vm2, %v1205_v20 }
 0x379   : > { %v1277_v12 = vpop.permute.xlu0 %1276 }
 0x37b   : > { %1197 = vadd.xlane.f32.xlu1 %v1196_v59 }
 0x381   : > { %v1373_v0 = vpop.permute.xlu0 %1372 }
 0x382   : > { %1393 = vmatpush.bf16.msra.mxu0 %v1373_v0 }
 0x389   : > { %v1371_v50 = vpop.permute.xlu0 %1370 }
 0x38a   : > { %1394 = vmatpush.bf16.msra.mxu0 %v1371_v50 }
 0x391   : > { %v1489_v2 = vpop.permute.xlu0 %1488 }
 0x392   : > { %v1509_v9 = vsel %vm1127_vm1, %v1489_v2, 0 }
 0x399   : > { %v1369_v38 = vpop.permute.xlu0 %1368 }
 0x39a   : > { %1395 = vmatpush.bf16.msra.mxu0 %v1369_v38 }
 0x3a1   : > { %v1367_v61 = vpop.permute.xlu0 %1366 }
 0x3a2   : > { %1396 = vmatpush.bf16.msra.mxu0 %v1367_v61 }
 0x3a3   : > { %v1177_v54 = vpop.xlane.xlu1 %1176 }
 0x3a4   : > { %v1183_v60 = vsub.f32 %v1163_v43, %v1177_v54 }
 0x3a6   : > { %1514 = vmatpush.bf16.xpose.msrb.mxu0 %v1509_v9  ;;  %v1189_v4 = vmul.f32 1.442695, %v1183_v60 }
 0x3a8   : > { %2159 = vpow2.f32 %v1189_v4 }
 0x3a9   : > { %v1487_v5 = vpop.permute.xlu0 %1486 }
 0x3aa   : > { %v1506_v6 = vsel %vm1127_vm1, %v1487_v5, 0 }
 0x3ab   : > { %v1180_v63 = vpop.xlane.xlu1 %1179 }
 0x3ac   : > { %v1184_v10 = vsub.f32 %v1165_v44, %v1180_v63 }
 0x3ae   : > { %1515 = vmatpush.bf16.xpose.msrb.mxu0 %v1506_v6  ;;  %v2160_v11 = vpop.eup %2159  ;;  %v1191_v29 = vmul.f32 1.442695, %v1184_v10 }
 0x3af   : > { %v1199_v39 = vsel %vm1168_vm2, %v2160_v11, 0.0 }
 0x3b0   : > { %2161 = vpow2.f32 %v1191_v29  ;;  %1200 = vadd.xlane.f32.xlu0 %v1199_v39 }
 0x3b1   : > { %v1485_v13 = vpop.permute.xlu0 %1484 }
 0x3b2   : > { %v1503_v14 = vsel %vm1127_vm1, %v1485_v13, 0 }
 0x3b6   : > { %1516 = vmatpush.bf16.xpose.msrb.mxu0 %v1503_v14  ;;  %v2162_v15 = vpop.eup %2161 }
 0x3b7   : > { %v1206_v16 = vpack.c.bf16 %v2162_v15, %v2160_v11  ;;  %v1202_v37 = vsel %vm1168_vm2, %v2162_v15, 0.0 }
 0x3b9   : > { %2037 = vmatmul.msk.bf16.gmra.mxu1 %vm1168_vm2, %v1206_v16  ;;  %v1483_v25 = vpop.permute.xlu0 %1482 }
 0x3ba   : > { %v1500_v18 = vsel %vm1127_vm1, %v1483_v25, 0 }
 0x3be   : > { %1517 = vmatpush.bf16.xpose.msrb.mxu0 %v1500_v18 }
 0x3c1   : > { %v1665_v2 = vpop.permute.xlu0 %1664 }
 0x3c3   : > { %v1283_v19 = vpop.permute.xlu1 %1282 }
 0x3c4   : > { %v1301_v21 = vsel %vm1127_vm1, %v1283_v19, 0  ;;  %1658 = vrot.lane.b32.xlu0 %v2637_v57, %s2266_s15 }
 0x3c5   : > { %1314 = vmatpush.bf16.xpose.msra.mxu1 %v1301_v21 }
 0x3cc   : > { %1574 = vrot.lane.b32.xlu0 %v2683_v1, %s2265_s24 }
 0x3cd   : > { %1315 = vmatpush.bf16.xpose.msra.mxu1 %v1298_v53 }
 0x3d4   : > { %1754 = vrot.lane.b32.xlu0 %v2667_v41, %s2266_s15 }
 0x3d5   : > { %1316 = vmatpush.bf16.xpose.msra.mxu1 %v1295_v17 }
 0x3dc   : > { %2038 = vmatmul.msk.bf16.vlgmr.msra.gmra.mxu1 %vm1127_vm1, %v2720_v23 }
 0x3de   : > { %v1195_v62 = vpop.xlane.xlu2 %1194 }
 0x3df   : > { %2163 = vrcp.f32 %v1195_v62 }
 0x3e5   : > { %v2164_v31 = vpop.eup %2163 }
 0x3ec   : > { %2039 = vmatmul.msk.bf16.gmra.mxu1 %vm1127_vm1, %v1277_v12 }
 0x3ee   : > { %v1198_v26 = vpop.xlane.xlu1 %1197 }
 0x3ef   : > { %2165 = vrcp.f32 %v1198_v26 }
 0x3f1   : > { %v1253_v30 = vpop.f32.mrf.mxu1 }
 0x3f2   : > { %v1267_v42 = vmul.f32 %v2164_v31, %v1253_v30 }
 0x3f5   : > { %v2166_v32 = vpop.eup %2165 }
 0x3f9   : > { %v1255_v33 = vpop.f32.mrf.mxu1 }
 0x3fa   : > { %v1268_v43 = vmul.f32 %v2166_v32, %v1255_v33 }
 0x3fc   : > { %v1271_v56 = vpack.c.bf16 %v1268_v43, %v1267_v42 }
 0x3fe   : > { %2045 = vmatmul.msk.bf16.vlgmr.msrb.gmra.mxu3 %vm1127_vm1, %v1271_v56 }
 0x423   : > { %v1201_v4 = vpop.xlane.xlu0 %1200 }
 0x436   : > { %v1258_v44 = vpop.f32.mrf.mxu1  ;;  %v1659_v53 = vpop.permute.xlu0 %1658 }
 0x437   : > { %v1675_v52 = vsel %vm1127_vm1, %v1659_v53, 0 }
 0x43e   : > { %v1260_v23 = vpop.f32.mrf.mxu1  ;;  %v1575_v32 = vpop.permute.xlu0 %1574 }
 0x446   : > { %v1755_v42 = vpop.permute.xlu0 %1754 }
 0x447   : > { %v1767_v56 = vsel %vm1240_vm15, %v1755_v42, 0 }
 0x459   : > { %v1318_v45 = vpop.f32.mrf.mxu1 }
 0x45a   : > { %v1328_v46 = vsel %vm1168_vm2, %v1318_v45, -inf }
 0x45b   : > { %1329 = vmax.xlane.f32.xlu2 %v1328_v46 }
 0x461   : > { %v1320_v47 = vpop.f32.mrf.mxu1 }
 0x462   : > { %v1331_v48 = vsel %vm1168_vm2, %v1320_v47, -inf }
 0x463   : > { %1332 = vmax.xlane.f32.xlu1 %v1331_v48 }
 0x469   : > { %v1323_v35 = vpop.f32.mrf.mxu1 }
 0x46a   : > { %v1334_v49 = vsel %vm1168_vm2, %v1323_v35, -inf }
 0x46b   : > { %1335 = vmax.xlane.f32.xlu2 %v1334_v49 }
 0x471   : > { %v1325_v36 = vpop.f32.mrf.mxu1 }
 0x472   : > { %v1337_v51 = vsel %vm1168_vm2, %v1325_v36, -inf }
 0x47c   : > { %1480 = vrot.lane.b32.xlu1 %v2637_v57, %s2265_s24 }
 0x483   : > { %1666 = vrot.lane.b32.xlu2 %v2664_v28, %s2266_s15 }
 0x484   : > { %1476 = vrot.lane.b32.xlu1 %v2699_v40, %s2265_s24 }
 0x48c   : > { %1662 = vrot.lane.b32.xlu1 %v2697_v8, %s2266_s15 }
 0x4ac   : > { %1203 = vadd.xlane.f32.xlu2 %v1202_v37 }
 0x4b6   : > { %1338 = vmax.xlane.f32.xlu1 %v1337_v51 }
 0x4c4   : > { %1656 = vrot.lane.b32.xlu2 %v2718_v22, %s2266_s15 }
 0x4cc   : > { %1572 = vrot.lane.b32.xlu2 %v2688_v3, %s2265_s24 }
 0x4ce   : > { %v1330_v57 = vpop.xlane.xlu2 %1329 }
 0x4cf   : > { %1660 = vrot.lane.b32.xlu1 %v2685_v34, %s2266_s15  ;;  %v1340_v28 = vsub.f32 %v1318_v45, %v1330_v57  ;;  %v2841_v45 = vpop.f32.mrf.mxu3 }
 0x4d1   : > { %v1344_v8 = vmul.f32 1.442695, %v1340_v28 }
 0x4d3   : > { %2167 = vpow2.f32 %v1344_v8 }
 0x4d4   : > { %1570 = vrot.lane.b32.xlu2 %v2695_v7, %s2265_s24 }
 0x4d6   : > { %v1333_v58 = vpop.xlane.xlu1 %1332 }
 0x4d7   : > { %v1341_v55 = vsub.f32 %v1320_v47, %v1333_v58  ;;  %1478 = vrot.lane.b32.xlu1 %v2718_v22, %s2265_s24  ;;  %v2845_v47 = vpop.f32.mrf.mxu3 }
 0x4d9   : > { %v1346_v20 = vmul.f32 1.442695, %v1341_v55  ;;  %v2808_v34 = vpop.eup %2167 }
 0x4db   : > { %2169 = vpow2.f32 %v1346_v20 }
 0x4dc   : > { %1568 = vrot.lane.b32.xlu2 %v2639_v27, %s2265_s24  ;;  %2171 = vrcp.f32 %v1201_v4 }
 0x4de   : > { %v1336_v12 = vpop.xlane.xlu2 %1335 }
 0x4df   : > { %1654 = vrot.lane.b32.xlu1 %v2699_v40, %s2266_s15  ;;  %v1684_v40 = vsel %vm1127_vm1, %v1665_v2, 0 }
 0x4e1   : > { %v2810_v59 = vpop.eup %2169 }
 0x4e2   : > { %v1364_v0 = vpack.c.bf16 %v2810_v59, %v2808_v34  ;;  %v2172_v6 = vpop.eup %2171 }
 0x4e3   : > { %v1269_v10 = vmul.f32 %v2172_v6, %v1258_v44 }
 0x4e4   : > { %2040 = vmatmul.msk.bf16.vlgmr.msra.gmra.mxu0 %vm1168_vm2, %v1364_v0 }
 0x4e6   : > { %v1667_v22 = vpop.permute.xlu2 %1666 }
 0x4e7   : > { %v1687_v50 = vsel %vm1127_vm1, %v1667_v22, 0  ;;  %1576 = vrot.lane.b32.xlu1 %v2667_v41, %s2265_s24  ;;  %v1342_v41 = vsub.f32 %v1323_v35, %v1336_v12  ;;  %v1355_v22 = vsel %vm1168_vm2, %v2810_v59, 0.0  ;;  %v1352_v59 = vsel %vm1168_vm2, %v2808_v34, 0.0 }
 0x4e8   : > { %1692 = vmatpush.bf16.xpose.msra.mxu3 %v1687_v50 }
 0x4e9   : > { %v1348_v29 = vmul.f32 1.442695, %v1342_v41 }
 0x4ee   : > { %v1481_v38 = vpop.permute.xlu1 %1480 }
 0x4ef   : > { %v1497_v61 = vsel %vm1127_vm1, %v1481_v38, 0 }
 0x4f0   : > { %1518 = vmatpush.bf16.xpose.msrb.mxu0 %v1497_v61  ;;  %1693 = vmatpush.bf16.xpose.msra.mxu3 %v1684_v40 }
 0x4f6   : > { %v1477_v9 = vpop.permute.xlu1 %1476 }
 0x4fe   : > { %v1663_v54 = vpop.permute.xlu1 %1662 }
 0x4ff   : > { %v1681_v60 = vsel %vm1127_vm1, %v1663_v54, 0 }
 0x500   : > { %1694 = vmatpush.bf16.xpose.msra.mxu3 %v1681_v60 }
 0x51f   : > { %v1204_v5 = vpop.xlane.xlu2 %1203 }
 0x520   : > { %2173 = vrcp.f32 %v1204_v5 }
 0x521   : > { %2175 = vpow2.f32 %v1348_v29 }
 0x526   : > { %v2174_v63 = vpop.eup %2173 }
 0x527   : > { %v1270_v11 = vmul.f32 %v2174_v63, %v1260_v23  ;;  %v2822_v16 = vpop.eup %2175  ;;  %v1657_v24 = vpop.permute.xlu2 %1656 }
 0x528   : > { %v1358_v2 = vsel %vm1168_vm2, %v2822_v16, 0.0 }
 0x529   : > { %v1339_v39 = vpop.xlane.xlu1 %1338  ;;  %v1272_v13 = vpack.c.bf16 %v1270_v11, %v1269_v10 }
 0x52a   : > { %v1343_v14 = vsub.f32 %v1325_v36, %v1339_v39 }
 0x52b   : > { %2046 = vmatmul.msk.bf16.gmra.mxu3 %vm1127_vm1, %v1272_v13 }
 0x52c   : > { %v1350_v15 = vmul.f32 1.442695, %v1343_v14 }
 0x52e   : > { %2177 = vpow2.f32 %v1350_v15 }
 0x52f   : > { %v1573_v26 = vpop.permute.xlu2 %1572 }
 0x534   : > { %v2824_v25 = vpop.eup %2177 }
 0x535   : > { %v1365_v18 = vpack.c.bf16 %v2824_v25, %v2822_v16 }
 0x537   : > { %2041 = vmatmul.msk.bf16.gmra.mxu0 %vm1168_vm2, %v1365_v18  ;;  %v1571_v33 = vpop.permute.xlu2 %1570 }
 0x53f   : > { %v1569_v43 = vpop.permute.xlu2 %1568 }
 0x541   : > { %v1661_v19 = vpop.permute.xlu1 %1660 }
 0x542   : > { %v1678_v21 = vsel %vm1127_vm1, %v1661_v19, 0 }
 0x543   : > { %1695 = vmatpush.bf16.xpose.msra.mxu3 %v1678_v21 }
 0x547   : > { %2047 = vmatmul.msk.bf16.vlgmr.msrb.gmra.mxu0 %vm1127_vm1, %v1477_v9  ;;  %v1361_v9 = vsel %vm1168_vm2, %v2824_v25, 0.0 }
 0x549   : > { %v1479_v17 = vpop.permute.xlu1 %1478 }
 0x54b   : > { %1696 = vmatpush.bf16.xpose.msra.mxu3 %v1675_v52 }
 0x551   : > { %v1655_v62 = vpop.permute.xlu1 %1654 }
 0x552   : > { %2054 = vmatmul.msk.bf16.vlgmr.msra.gmra.mxu3 %vm1127_vm1, %v1655_v62 }
 0x557   : > { %2048 = vmatmul.msk.bf16.gmra.mxu0 %vm1127_vm1, %v1479_v17 }
 0x559   : > { %v1577_v30 = vpop.permute.xlu1 %1576 }
 0x55a   : > { %v1589_v31 = vsel %vm1240_vm15, %v1577_v30, 0 }
 0x55b   : > { %1594 = vmatpush.bf16.msrb.mxu1 %v1589_v31 }
 0x55f   : > { %1595 = vmatpush.bf16.msrb.mxu1 %v1575_v32  ;;  %v2042_v32 = vld [vmem:[%s2969_s11 + $0x4] sm:$0xf] }
 0x561   : > { %v2837_v44 = vpop.f32.mrf.mxu0 }
 0x562   : > { %2055 = vmatmul.msk.bf16.gmra.mxu3 %vm1127_vm1, %v1657_v24 }
 0x563   : > { %1596 = vmatpush.bf16.msrb.mxu1 %v1573_v26 }
 0x567   : > { %1597 = vmatpush.bf16.msrb.mxu1 %v1571_v33  ;;  %v1427_v33 = vsel %vm1240_vm15, %v2042_v32, 0 }
 0x568   : > { %1436 = vmatpush.bf16.msrb.mxu2 %v1427_v33 }
 0x569   : > { %v2839_v23 = vpop.f32.mrf.mxu0 }
 0x56b   : > { %1598 = vmatpush.bf16.msrb.mxu1 %v1569_v43 }
 0x56f   : > { %1772 = vmatpush.bf16.msra.mxu1 %v1767_v56 }
 0x5ae   : > { %v2849_v35 = vpop.f32.mrf.mxu3 }
 0x5b4   : > { %v2843_v46 = vpop.f32.mrf.mxu0 }
 0x5b6   : > { %v2852_v51 = vpop.f32.mrf.mxu3 }
 0x5bc   : > { %v2847_v48 = vpop.f32.mrf.mxu0 }
 0x5c4   : > { %v1520_v49 = vpop.f32.mrf.mxu0 }
 0x5c5   : > { %v1530_v37 = vsel %vm1168_vm2, %v1520_v49, -inf }
 0x5c6   : > { %1531 = vmax.xlane.f32.xlu1 %v1530_v37 }
 0x5cc   : > { %v1522_v36 = vpop.f32.mrf.mxu0 }
 0x5cd   : > { %v1533_v57 = vsel %vm1168_vm2, %v1522_v36, -inf }
 0x5ce   : > { %1534 = vmax.xlane.f32.xlu0 %v1533_v57 }
 0x5d4   : > { %v1525_v28 = vpop.f32.mrf.mxu0 }
 0x5d5   : > { %v1698_v8 = vpop.f32.mrf.mxu3  ;;  %v1536_v58 = vsel %vm1168_vm2, %v1525_v28, -inf }
 0x5d6   : > { %1537 = vmax.xlane.f32.xlu2 %v1536_v58  ;;  %v1708_v55 = vsel %vm1168_vm2, %v1698_v8, -inf }
 0x5d7   : > { %1709 = vmax.xlane.f32.xlu0 %v1708_v55 }
 0x5dc   : > { %v1527_v20 = vpop.f32.mrf.mxu0 }
 0x5dd   : > { %v1539_v12 = vsel %vm1168_vm2, %v1527_v20, -inf  ;;  %v2866_v0 = vpop.f32.mrf.mxu3 }
 0x5de   : > { %1540 = vmax.xlane.f32.xlu1 %v1539_v12 }
 0x5e5   : > { %v2870_v50 = vpop.f32.mrf.mxu3 }
 0x5eb   : > { %1746 = vrot.lane.b32.xlu0 %v2639_v27, %s2266_s15  ;;  %v1714_v27 = vsel %vm1168_vm2, %v2870_v50, -inf }
 0x5ee   : > { %1750 = vrot.lane.b32.xlu2 %v2688_v3, %s2266_s15  ;;  %v1711_v3 = vsel %vm1168_vm2, %v2866_v0, -inf }
 0x5f6   : > { %1748 = vrot.lane.b32.xlu2 %v2695_v7, %s2266_s15  ;;  %v2876_v7 = vpop.f32.mrf.mxu3 }
 0x5f7   : > { %1752 = vrot.lane.b32.xlu1 %v2683_v1, %s2266_s15  ;;  %v1717_v1 = vsel %vm1168_vm2, %v2876_v7, -inf }
 0x615   : > { %1356 = vadd.xlane.f32.xlu0 %v1355_v22 }
 0x61f   : > { %1715 = vmax.xlane.f32.xlu2 %v1714_v27 }
 0x621   : > { %1712 = vmax.xlane.f32.xlu1 %v1711_v3 }
 0x629   : > { %1718 = vmax.xlane.f32.xlu1 %v1717_v1 }
 0x631   : > { %1353 = vadd.xlane.f32.xlu1 %v1352_v59 }
 0x639   : > { %1359 = vadd.xlane.f32.xlu1 %v1358_v2  ;;  %v1532_v38 = vpop.xlane.xlu1 %1531 }
 0x63a   : > { %v1542_v40 = vsub.f32 %v1520_v49, %v1532_v38 }
 0x63c   : > { %v1546_v61 = vmul.f32 1.442695, %v1542_v40 }
 0x63e   : > { %2179 = vpow2.f32 %v1546_v61 }
 0x641   : > { %v1535_v54 = vpop.xlane.xlu0 %1534  ;;  %1362 = vadd.xlane.f32.xlu1 %v1361_v9 }
 0x642   : > { %v1543_v60 = vsub.f32 %v1522_v36, %v1535_v54  ;;  %v2051_v54 = vld [vmem:[%s2969_s11 + $0x8] sm:$0xf] }
 0x644   : > { %v1548_v4 = vmul.f32 1.442695, %v1543_v60  ;;  %v2180_v5 = vpop.eup %2179  ;;  %v1629_v60 = vsel %vm1240_vm15, %v2051_v54, 0 }
 0x645   : > { %v1554_v34 = vsel %vm1168_vm2, %v2180_v5, 0.0  ;;  %1638 = vmatpush.bf16.msra.mxu2 %v1629_v60 }
 0x646   : > { %2181 = vpow2.f32 %v1548_v4 }
 0x649   : > { %v1538_v6 = vpop.xlane.xlu2 %1537  ;;  %1555 = vadd.xlane.f32.xlu1 %v1554_v34 }
 0x64a   : > { %v1544_v41 = vsub.f32 %v1525_v28, %v1538_v6  ;;  %v1710_v63 = vpop.xlane.xlu0 %1709 }
 0x64b   : > { %v1720_v10 = vsub.f32 %v1698_v8, %v1710_v63 }
 0x64c   : > { %v2182_v11 = vpop.eup %2181  ;;  %v1550_v29 = vmul.f32 1.442695, %v1544_v41 }
 0x64d   : > { %v1566_v39 = vpack.c.bf16 %v2182_v11, %v2180_v5  ;;  %v1724_v13 = vmul.f32 1.442695, %v1720_v10  ;;  %v1557_v14 = vsel %vm1168_vm2, %v2182_v11, 0.0 }
 0x64e   : > { %2183 = vpow2.f32 %v1550_v29  ;;  %1558 = vadd.xlane.f32.xlu2 %v1557_v14 }
 0x64f   : > { %2185 = vpow2.f32 %v1724_v13  ;;  %2049 = vmatmul.msk.bf16.vlgmr.msrb.gmra.mxu1 %vm1168_vm2, %v1566_v39 }
 0x651   : > { %v1541_v15 = vpop.xlane.xlu1 %1540  ;;  %v1751_v62 = vpop.permute.xlu2 %1750 }
 0x652   : > { %v1545_v16 = vsub.f32 %v1527_v20, %v1541_v15 }
 0x654   : > { %v2184_v25 = vpop.eup %2183  ;;  %v1552_v18 = vmul.f32 1.442695, %v1545_v16 }
 0x655   : > { %v2186_v19 = vpop.eup %2185  ;;  %v1560_v21 = vsel %vm1168_vm2, %v2184_v25, 0.0 }
 0x656   : > { %2187 = vpow2.f32 %v1552_v18  ;;  %1561 = vadd.xlane.f32.xlu1 %v1560_v21  ;;  %v1732_v53 = vsel %vm1168_vm2, %v2186_v19, 0.0 }
 0x657   : > { %1733 = vadd.xlane.f32.xlu0 %v1732_v53 }
 0x659   : > { %v1749_v30 = vpop.permute.xlu2 %1748 }
 0x65c   : > { %v2188_v17 = vpop.eup %2187 }
 0x65d   : > { %v1563_v52 = vsel %vm1168_vm2, %v2188_v17, 0.0  ;;  %v1567_v24 = vpack.c.bf16 %v2188_v17, %v2184_v25  ;;  %v1747_v31 = vpop.permute.xlu0 %1746  ;;  %v2058_v17 = vld [vmem:[%s2969_s11 + $0xc] sm:$0xf] }
 0x65e   : > { %1564 = vadd.xlane.f32.xlu2 %v1563_v52  ;;  %v1807_v52 = vsel %vm1240_vm15, %v2058_v17, 0 }
 0x65f   : > { %2050 = vmatmul.msk.bf16.gmra.mxu1 %vm1168_vm2, %v1567_v24  ;;  %1816 = vmatpush.bf16.msra.mxu0 %v1807_v52 }
 0x669   : > { %v1753_v26 = vpop.permute.xlu1 %1752 }
 0x66a   : > { %1773 = vmatpush.bf16.msra.mxu1 %v1753_v26 }
 0x66e   : > { %1774 = vmatpush.bf16.msra.mxu1 %v1751_v62 }
 0x672   : > { %1775 = vmatpush.bf16.msra.mxu1 %v1749_v30 }
 0x676   : > { %1776 = vmatpush.bf16.msra.mxu1 %v1747_v31 }
 0x688   : > { %v1357_v12 = vpop.xlane.xlu0 %1356 }
 0x692   : > { %v1716_v42 = vpop.xlane.xlu2 %1715 }
 0x693   : > { %v1722_v43 = vsub.f32 %v2870_v50, %v1716_v42 }
 0x694   : > { %v1713_v56 = vpop.xlane.xlu1 %1712 }
 0x695   : > { %v1728_v49 = vmul.f32 1.442695, %v1722_v43  ;;  %v1721_v37 = vsub.f32 %v2866_v0, %v1713_v56 }
 0x697   : > { %2189 = vpow2.f32 %v1728_v49  ;;  %v1726_v36 = vmul.f32 1.442695, %v1721_v37 }
 0x699   : > { %2191 = vpow2.f32 %v1726_v36 }
 0x69c   : > { %v1719_v57 = vpop.xlane.xlu1 %1718 }
 0x69d   : > { %v2190_v28 = vpop.eup %2189  ;;  %v1723_v8 = vsub.f32 %v2876_v7, %v1719_v57 }
 0x69e   : > { %v1738_v58 = vsel %vm1168_vm2, %v2190_v28, 0.0 }
 0x69f   : > { %v2192_v55 = vpop.eup %2191  ;;  %v1730_v20 = vmul.f32 1.442695, %v1723_v8  ;;  %1739 = vadd.xlane.f32.xlu1 %v1738_v58 }
 0x6a0   : > { %v1744_v22 = vpack.c.bf16 %v2192_v55, %v2186_v19  ;;  %v1735_v0 = vsel %vm1168_vm2, %v2192_v55, 0.0 }
 0x6a1   : > { %2193 = vpow2.f32 %v1730_v20 }
 0x6a2   : > { %2056 = vmatmul.msk.bf16.vlgmr.msra.gmra.mxu1 %vm1168_vm2, %v1744_v22  ;;  %2195 = vrcp.f32 %v1357_v12 }
 0x6a4   : > { %v1354_v50 = vpop.xlane.xlu1 %1353 }
 0x6a5   : > { %2197 = vrcp.f32 %v1354_v50 }
 0x6a7   : > { %v2194_v27 = vpop.eup %2193  ;;  %1736 = vadd.xlane.f32.xlu1 %v1735_v0 }
 0x6a8   : > { %v1741_v3 = vsel %vm1168_vm2, %v2194_v27, 0.0  ;;  %v2196_v7 = vpop.eup %2195  ;;  %v1745_v61 = vpack.c.bf16 %v2194_v27, %v2190_v28 }
 0x6a9   : > { %1742 = vadd.xlane.f32.xlu2 %v1741_v3  ;;  %v1413_v59 = vmul.f32 %v2196_v7, %v2839_v23 }
 0x6ab   : > { %v2198_v1 = vpop.eup %2197 }
 0x6ac   : > { %v1412_v2 = vmul.f32 %v2198_v1, %v2837_v44  ;;  %v1360_v38 = vpop.xlane.xlu1 %1359 }
 0x6ad   : > { %2199 = vrcp.f32 %v1360_v38  ;;  %v2219_v38 = vld [vmem:[%s2449_s25] sm:$0xff] }
 0x6ae   : > { %v1416_v40 = vpack.c.bf16 %v1413_v59, %v1412_v2  ;;  %v2124_v2 = vld [vmem:[%s2970_s12] ss:$0 sm:$0xff] }
 0x6b0   : > { %2043 = vmatmul.msk.bf16.vlgmr.msrb.gmra.mxu2 %vm1127_vm1, %v1416_v40 }
 0x6b1   : > { %2075 = vmatpush.bf16.msrb.mxu2 %v1807_v52 }
 0x6b2   : > { %2057 = vmatmul.msk.bf16.gmra.mxu1 %vm1168_vm2, %v1745_v61 }
 0x6b3   : > { %v2200_v23 = vpop.eup %2199 }
 0x6b4   : > { %v1363_v9 = vpop.xlane.xlu1 %1362  ;;  %v1414_v44 = vmul.f32 %v2200_v23, %v2843_v46 }
 0x6b5   : > { %2201 = vrcp.f32 %v1363_v9 }
 0x6bb   : > { %v2202_v4 = vpop.eup %2201 }
 0x6bc   : > { %v1415_v5 = vmul.f32 %v2202_v4, %v2847_v48  ;;  %v1556_v6 = vpop.xlane.xlu1 %1555  ;;  %v2220_v4 = vld [vmem:[%s2449_s25 + $0x8] sm:$0xff] }
 0x6bd   : > { %2203 = vrcp.f32 %v1556_v6 }
 0x6be   : > { %v1417_v34 = vpack.c.bf16 %v1415_v5, %v1414_v44 }
 0x6c0   : > { %2044 = vmatmul.msk.bf16.gmra.mxu2 %vm1127_vm1, %v1417_v34 }
 0x6c1   : > { %v1559_v41 = vpop.xlane.xlu2 %1558 }
 0x6c2   : > { %2205 = vrcp.f32 %v1559_v41 }
 0x6c3   : > { %v2204_v10 = vpop.eup %2203 }
 0x6c8   : > { %v2206_v11 = vpop.eup %2205 }
 0x6c9   : > { %v1562_v15 = vpop.xlane.xlu1 %1561 }
 0x6ca   : > { %2207 = vrcp.f32 %v1562_v15  ;;  %v1734_v62 = vpop.xlane.xlu0 %1733 }
 0x6cc   : > { %v1600_v63 = vpop.f32.mrf.mxu1 }
 0x6cd   : > { %v1614_v39 = vmul.f32 %v2204_v10, %v1600_v63 }
 0x6d0   : > { %v2208_v48 = vpop.eup %2207 }
 0x6d1   : > { %v1565_v46 = vpop.xlane.xlu2 %1564 }
 0x6d2   : > { %2209 = vrcp.f32 %v1565_v46  ;;  %v2222_v46 = vld [vmem:[%s2449_s25 + $0x18] sm:$0xff] }
 0x6d3   : > { %2211 = vrcp.f32 %v1734_v62 }
 0x6d4   : > { %v1602_v29 = vpop.f32.mrf.mxu1 }
 0x6d5   : > { %v1615_v13 = vmul.f32 %v2206_v11, %v1602_v29  ;;  %v2221_v11 = vld [vmem:[%s2449_s25 + $0x10] sm:$0xff] }
 0x6d7   : > { %v1618_v14 = vpack.c.bf16 %v1615_v13, %v1614_v39 }
 0x6d8   : > { %v2210_v25 = vpop.eup %2209 }
 0x6d9   : > { %2052 = vmatmul.msk.bf16.vlgmr.msra.gmra.mxu2 %vm1127_vm1, %v1618_v14  ;;  %v2212_v31 = vpop.eup %2211 }
 0x6dc   : > { %v1605_v16 = vpop.f32.mrf.mxu1 }
 0x6dd   : > { %v1616_v19 = vmul.f32 %v2208_v48, %v1605_v16 }
 0x6e4   : > { %v1607_v18 = vpop.f32.mrf.mxu1 }
 0x6e5   : > { %v1617_v21 = vmul.f32 %v2210_v25, %v1607_v18 }
 0x6e7   : > { %v1619_v53 = vpack.c.bf16 %v1617_v21, %v1616_v19 }
 0x6e9   : > { %2053 = vmatmul.msk.bf16.gmra.mxu2 %vm1127_vm1, %v1619_v53 }
 0x712   : > { %v1740_v24 = vpop.xlane.xlu1 %1739 }
 0x71a   : > { %v1737_v26 = vpop.xlane.xlu1 %1736 }
 0x71b   : > { %2213 = vrcp.f32 %v1737_v26 }
 0x71c   : > { %v1743_v49 = vpop.xlane.xlu2 %1742  ;;  %2215 = vrcp.f32 %v1740_v24 }
 0x71d   : > { %2217 = vrcp.f32 %v1743_v49 }
 0x71f   : > { %v1778_v30 = vpop.f32.mrf.mxu1 }
 0x720   : > { %v1792_v42 = vmul.f32 %v2212_v31, %v1778_v30 }
 0x721   : > { %v2214_v32 = vpop.eup %2213 }
 0x722   : > { %v2216_v36 = vpop.eup %2215 }
 0x723   : > { %v2218_v57 = vpop.eup %2217 }
 0x727   : > { %v1780_v33 = vpop.f32.mrf.mxu1 }
 0x728   : > { %v1793_v43 = vmul.f32 %v2214_v32, %v1780_v33 }
 0x72a   : > { %v1796_v56 = vpack.c.bf16 %v1793_v43, %v1792_v42 }
 0x72c   : > { %2059 = vmatmul.msk.bf16.vlgmr.msra.gmra.mxu0 %vm1127_vm1, %v1796_v56 }
 0x72f   : > { %v1783_v37 = vpop.f32.mrf.mxu1 }
 0x730   : > { %v1794_v8 = vmul.f32 %v2216_v36, %v1783_v37 }
 0x733   : > { %v1438_v20 = vpop.f32.mrf.mxu2 }
 0x734   : > { %v1467_v3 = vadd.f32 %v2841_v45, %v1438_v20 }
 0x737   : > { %v1785_v28 = vpop.f32.mrf.mxu1 }
 0x738   : > { %v1795_v58 = vmul.f32 %v2218_v57, %v1785_v28 }
 0x73a   : > { %v1797_v55 = vpack.c.bf16 %v1795_v58, %v1794_v8 }
 0x73b   : > { %v1440_v12 = vpop.f32.mrf.mxu2 }
 0x73c   : > { %2060 = vmatmul.msk.bf16.vlgmr.msrb.gmra.mxu2 %vm1127_vm1, %v1797_v55  ;;  %v1469_v9 = vadd.f32 %v2845_v47, %v1440_v12 }
 0x743   : > { %v1443_v22 = vpop.f32.mrf.mxu2 }
 0x744   : > { %v1472_v6 = vadd.f32 %v2849_v35, %v1443_v22 }
 0x74b   : > { %v1445_v50 = vpop.f32.mrf.mxu2 }
 0x74c   : > { %v1474_v29 = vadd.f32 %v2852_v51, %v1445_v50 }
 0x75c   : > { %v1640_v0 = vpop.f32.mrf.mxu2 }
 0x75d   : > { %v1650_v7 = vadd.f32 %v1640_v0, %v1467_v3 }
 0x764   : > { %v1642_v27 = vpop.f32.mrf.mxu2 }
 0x765   : > { %v1651_v45 = vadd.f32 %v1642_v27, %v1469_v9 }
 0x76c   : > { %v1645_v61 = vpop.f32.mrf.mxu2 }
 0x76d   : > { %v1652_v41 = vadd.f32 %v1645_v61, %v1472_v6 }
 0x774   : > { %v1647_v34 = vpop.f32.mrf.mxu2 }
 0x775   : > { %v1653_v13 = vadd.f32 %v1647_v34, %v1474_v29 }
 0x7a9   : > { %v1818_v1 = vpop.f32.mrf.mxu0 }
 0x7aa   : > { %v1828_v59 = vadd.f32 %v1818_v1, %v1650_v7 }
 0x7ac   : > { %v1832_v40 = vadd.f32 %v2219_v38, %v1828_v59 }
 0x7ae   : > { %v1840_v54 = vadd.f32 %v2124_v2, %v1832_v40 }
 0x7b0   : > { %1844 = vst.msk [vmem:[%s515_s18] sm:$0xff] %vm581_vm0, %v1840_v54 }
 0x7b1   : > { %v1820_v60 = vpop.f32.mrf.mxu0 }
 0x7b2   : > { %v1829_v23 = vadd.f32 %v1820_v60, %v1651_v45 }
 0x7b4   : > { %v1833_v44 = vadd.f32 %v2220_v4, %v1829_v23 }
 0x7b6   : > { %v1841_v5 = vadd.f32 %v2124_v2, %v1833_v44 }
 0x7b8   : > { %1845 = vst.msk [vmem:[%s515_s18 + $0x8] sm:$0xff] %vm581_vm0, %v1841_v5 }
 0x7bf   : > { %v1823_v63 = vpop.f32.mrf.mxu2 }
 0x7c0   : > { %v1830_v10 = vadd.f32 %v1823_v63, %v1652_v41 }
 0x7c2   : > { %v1834_v47 = vadd.f32 %v2221_v11, %v1830_v10 }
 0x7c4   : > { %v1842_v39 = vadd.f32 %v2124_v2, %v1834_v47 }
 0x7c6   : > { %1846 = vst.msk [vmem:[%s515_s18 + $0x10] sm:$0xff] %vm581_vm0, %v1842_v39 }
 0x7c7   : > { %v1825_v14 = vpop.f32.mrf.mxu2 }
 0x7c8   : > { %v1831_v15 = vadd.f32 %v1825_v14, %v1653_v13 }
 0x7ca   : > { %v1835_v16 = vadd.f32 %v2222_v46, %v1831_v15 }
 0x7cc   : > { %v1843_v48 = vadd.f32 %v2124_v2, %v1835_v16 }
 0x7ce   : > { %1847 = vst.msk [vmem:[%s515_s18 + $0x18] sm:$0xff] %vm581_vm0, %v1843_v48 }
 0x7cf PF: > { %s23_s29 = sadd.s32 1, %s2261_s29   ;;  %s2976_s25 = smov %s2253_s27 }
 0x7d0   : > { %p20_p7 = scmp.ge.s32.totalorder %s23_s29, 6   ;;  %s2977_s26 = smov %s2257_s28 }
 0x7d1   : > { %s2978_s27 = smov %s2981_s30  ;;  %s2979_s28 = smov %s2985_s14 }
 0x7d2   :  { %22 = sbr.rel (!%p20_p7) target bundleno = 3 (0x3), region = 111 }

</bundles_post_ra>
